<compile_context>
chip_gen: v5e
topology: v5e:2x2
jax: 0.10.0
libtpu: 0.0.40
codegen_flags: <defaults>
</compile_context>

<pallas_src>
import jax
import jax.numpy as jnp
from jax.experimental import pallas as pl
from jax.experimental.pallas import tpu as pltpu

LANE = 128  # TPU lane width; packed output slab width


# ----------------------------- Pallas kernel -------------------------------
def bpm_mt_kernel(audio_ref, tok_ref,
                  w_audio_ref, embed_ref,
                  w_a_ref, w_t_ref, b_h_ref,
                  w_out_ref, b_out_ref,
                  out_ref):
    # ---- audio_model: tanh(audio @ W_audio) ----
    # (audio is a raw module input, so it arrives f32; the cast to bf16 for the
    #  MXU happens in-register here — no separate HBM cast pass.)
    audio_feat = jnp.tanh(
        jnp.dot(audio_ref[...].astype(jnp.bfloat16), w_audio_ref[...],
                preferred_element_type=jnp.float32))          # (TB, Fa) f32

    # ---- language_model: embedding mean-pool as (one-hot mean) @ table ----
    tok = tok_ref[...]                                         # (TB, TL) int32
    tb, tl = tok.shape
    vocab = embed_ref.shape[0]
    vocab_iota = jax.lax.broadcasted_iota(jnp.int32, (tb, vocab), 1)
    counts = jnp.zeros((tb, vocab), jnp.float32)
    for t in range(tl):                                        # static unroll (TL small)
        counts = counts + (tok[:, t:t + 1] == vocab_iota).astype(jnp.float32)
    pooled = counts * (1.0 / tl)                               # exact in bf16 (multiples of 1/TL)
    text_feat = jnp.dot(pooled.astype(jnp.bfloat16), embed_ref[...],
                        preferred_element_type=jnp.float32)    # (TB, 768) f32

    # ---- Stage 1: fused fc_layer_1 + sentiment_fc_layer_1 ----
    pre = (jnp.dot(audio_feat.astype(jnp.bfloat16), w_a_ref[...],
                   preferred_element_type=jnp.float32)
           + jnp.dot(text_feat.astype(jnp.bfloat16), w_t_ref[...],
                     preferred_element_type=jnp.float32)
           + b_h_ref[...])                                     # (TB, 192) f32
    hs = jnp.maximum(pre, 0.0)                                 # ReLU (dropout = identity)

    # ---- Stage 2: block-diagonal classifier + sentiment_classifier ----
    acc = (jnp.dot(hs.astype(jnp.bfloat16), w_out_ref[...],
                   preferred_element_type=jnp.float32)
           + b_out_ref[...])                                   # (TB, 128) f32
    out_ref[...] = acc.astype(out_ref.dtype)                   # bf16 slab store (lane-dense)


# ------------------------------ batch tiling --------------------------------
def _choose_tb(B):
    """Batch tile: >=2 grid steps when possible (v7x megacore + DMA/compute
    overlap); cap at 256 rows (mem-bound kernel, bigger tiles buy nothing)."""
    if B <= 8:
        return B                    # block == full dim (allowed below 8-row granularity)
    tb = -(-B // 2)                 # ceil(B / 2)  -> at least 2 grid steps
    tb = -(-tb // 8) * 8            # round up to sublane multiple of 8
    return min(256, tb)


# ------------------------------ forward wrapper -----------------------------
def bpm_mt_forward(x_audio, x_text, packed):
    """Fused BPM_MT forward (mode='cross_entropy').

    x_audio: (B, C, AL) float32  -- x['audio']
    x_text : (B, TL)    int32    -- x['text'] token ids
    Returns {'logit': (B, num_class) f32, 'sentiment': (B, 5) f32}.
    """
    audio = x_audio[:, 0, :]                         # audio[:, 0, :] per the module
    B, AL = audio.shape
    TL = x_text.shape[1]
    Fa = packed["w_audio"].shape[1]
    V, DT = packed["embed"].shape
    HID = packed["w_t"].shape[1]                     # output_size + sentiment_output_size
    OUT_W = packed["w_out"].shape[1]                 # lane-dense packed slab width (>=128)
    nc, ns = packed["num_class"], packed["num_sent"]

    TB = _choose_tb(B)
    grid = (pl.cdiv(B, TB),)

    flops = 2 * B * (AL * Fa + V * DT + Fa * HID + DT * HID + HID * OUT_W)
    bytes_accessed = (
        audio.size * 4 + x_text.size * 4 + B * OUT_W * 2
        + sum(int(packed[k].size) * packed[k].dtype.itemsize
              for k in ("w_audio", "embed", "w_a", "w_t", "b_h", "w_out", "b_out")))

    out = pl.pallas_call(
        bpm_mt_kernel,
        out_shape=jax.ShapeDtypeStruct((B, OUT_W), jnp.bfloat16),
        grid_spec=pltpu.PrefetchScalarGridSpec(
            num_scalar_prefetch=0,
            grid=grid,
            in_specs=[
                # per-batch-tile activations / tokens
                pl.BlockSpec((TB, AL), lambda i: (i, 0)),
                pl.BlockSpec((TB, TL), lambda i: (i, 0)),
                # weights / tables / biases: VMEM-resident across all grid steps
                pl.BlockSpec((AL, Fa), lambda i: (0, 0)),
                pl.BlockSpec((V, DT), lambda i: (0, 0)),
                pl.BlockSpec((Fa, HID), lambda i: (0, 0)),
                pl.BlockSpec((DT, HID), lambda i: (0, 0)),
                pl.BlockSpec((1, HID), lambda i: (0, 0)),
                pl.BlockSpec((HID, OUT_W), lambda i: (0, 0)),
                pl.BlockSpec((1, OUT_W), lambda i: (0, 0)),
            ],
            out_specs=pl.BlockSpec((TB, OUT_W), lambda i: (i, 0)),
        ),
        compiler_params=pltpu.CompilerParams(
            dimension_semantics=("parallel",)),
        cost_estimate=pl.CostEstimate(flops=flops, transcendentals=B * Fa,
                                      bytes_accessed=bytes_accessed),
    )(audio, x_text,
      packed["w_audio"], packed["embed"],
      packed["w_a"], packed["w_t"], packed["b_h"],
      packed["w_out"], packed["b_out"])

    # Free wrapper-side slicing of the packed lane-dense slab (+ cast to f32).
    logit = out[:, :nc].astype(jnp.float32)
    sentiment = out[:, nc:nc + ns].astype(jnp.float32)
    return {"logit": logit, "sentiment": sentiment}


# --------------------------- parameter creation -----------------------------
def make_params(key, audio_feature_size=128, output_size=128,
                num_class=4, sentiment_output_size=64):
    """Torch-layout float32 parameters (reference semantics)."""
    ks = jax.random.split(key, 8)
    s = 0.02
    Fa = audio_feature_size
    return {
        # fc_layer_1: Linear(Fa + 768, output_size)   (concat order: [audio, text])
        "w1": s * jax.random.normal(ks[0], (Fa + 768, output_size), jnp.float32),
        "b1": s * jax.random.normal(ks[1], (output_size,), jnp.float32),
        # classifier: Linear(output_size, num_class)
        "wc": s * jax.random.normal(ks[2], (output_size, num_class), jnp.float32),
        "bc": s * jax.random.normal(ks[3], (num_class,), jnp.float32),
        # sentiment_fc_layer_1: Linear(768, sentiment_output_size)
        "ws": s * jax.random.normal(ks[4], (768, sentiment_output_size), jnp.float32),
        "bs": s * jax.random.normal(ks[5], (sentiment_output_size,), jnp.float32),
        # sentiment_classifier: Linear(sentiment_output_size, 5)
        "wsc": s * jax.random.normal(ks[6], (sentiment_output_size, 5), jnp.float32),
        "bsc": s * jax.random.normal(ks[7], (5,), jnp.float32),
    }


def pack_params(raw, w_audio_f32, embed_f32, audio_feature_size):
    """Build fused / packed bf16 kernel parameters from torch-layout f32."""
    Fa = audio_feature_size
    w1a, w1t = raw["w1"][:Fa], raw["w1"][Fa:]
    out_sz = raw["wc"].shape[0]
    sent_sz = raw["ws"].shape[1]
    nc = raw["wc"].shape[1]
    ns = raw["wsc"].shape[1]
    HID = out_sz + sent_sz
    OUT_W = max(LANE, ((nc + ns + LANE - 1) // LANE) * LANE)

    # Stage-1 weights: audio only feeds the fc_layer_1 half.
    w_a = jnp.concatenate([w1a, jnp.zeros((Fa, sent_sz), jnp.float32)], axis=1)
    w_t = jnp.concatenate([w1t, raw["ws"]], axis=1)
    b_h = jnp.concatenate([raw["b1"], raw["bs"]]).reshape(1, HID)

    # Stage-2 block-diagonal output projection -> lane-dense packed slab.
    top = jnp.concatenate(
        [raw["wc"], jnp.zeros((out_sz, OUT_W - nc), jnp.float32)], axis=1)
    bot = jnp.concatenate(
        [jnp.zeros((sent_sz, nc), jnp.float32), raw["wsc"],
         jnp.zeros((sent_sz, OUT_W - nc - ns), jnp.float32)], axis=1)
    w_out = jnp.concatenate([top, bot], axis=0)
    b_out = jnp.concatenate(
        [raw["bc"], raw["bsc"], jnp.zeros((OUT_W - nc - ns,), jnp.float32)]
    ).reshape(1, OUT_W)

    return {
        "w_audio": w_audio_f32.astype(jnp.bfloat16),   # synthetic audio_model proj
        "embed": embed_f32.astype(jnp.bfloat16),       # synthetic LM embedding table
        "w_a": w_a.astype(jnp.bfloat16),               # bf16 weights (half the DMA)
        "w_t": w_t.astype(jnp.bfloat16),
        "b_h": b_h,                                    # biases stay f32 (VPU path)
        "w_out": w_out.astype(jnp.bfloat16),
        "b_out": b_out,
        "num_class": nc,
        "num_sent": ns,
    }


# ------------------------------ pure-JAX reference ---------------------------
def reference_forward(x_audio, x_text, w_audio, embed_table, raw):
    hp = jax.lax.Precision.HIGHEST
    audio = x_audio[:, 0, :]
    audio_feat = jnp.tanh(jnp.dot(audio, w_audio, precision=hp))     # audio_model
    emb = jnp.take(embed_table, x_text, axis=0)                      # language_model
    text_feat = emb.mean(axis=1)
    concat = jnp.concatenate([audio_feat, text_feat], axis=1)
    h = jnp.maximum(jnp.dot(concat, raw["w1"], precision=hp) + raw["b1"], 0.0)
    logit = jnp.dot(h, raw["wc"], precision=hp) + raw["bc"]
    s = jnp.maximum(jnp.dot(text_feat, raw["ws"], precision=hp) + raw["bs"], 0.0)
    sent = jnp.dot(s, raw["wsc"], precision=hp) + raw["bsc"]
    return logit, sent


# ---------------------------------- main ------------------------------------
if __name__ == "__main__":
    key = jax.random.PRNGKey(0)
    k_in, k_par, k_sub = jax.random.split(key, 3)

    B, C, AL = 2, 1, 256          # x['audio'] : (B, C, AL)
    TL, vocab = 8, 32             # x['text']  : (B, TL) int tokens
    Fa = 128                      # audio_model.get_feature_size()

    k1, k2 = jax.random.split(k_in, 2)
    x = {
        "audio": jax.random.normal(k1, (B, C, AL), jnp.float32),
        "text": jax.random.randint(k2, (B, TL), 0, vocab, jnp.int32),
    }

    # synthetic submodule parameters (deterministic)
    w_audio = 0.05 * jax.random.normal(jax.random.fold_in(k_sub, 0), (AL, Fa), jnp.float32)
    embed_table = 0.1 * jax.random.normal(jax.random.fold_in(k_sub, 1), (vocab, 768), jnp.float32)

    raw = make_params(k_par, audio_feature_size=Fa, output_size=128,
                      num_class=4, sentiment_output_size=64)
    packed = pack_params(raw, w_audio, embed_table, audio_feature_size=Fa)

    # ---- fused forward (mode='cross_entropy') ----
    y = bpm_mt_forward(x["audio"], x["text"], packed)
    logit = jax.block_until_ready(y["logit"])
    sentiment = jax.block_until_ready(y["sentiment"])

    ref_logit, ref_sent = reference_forward(x["audio"], x["text"], w_audio, embed_table, raw)
    assert logit.shape == (B, 4) and sentiment.shape == (B, 5)
    # bf16 weights / activations / output slab in the kernel vs f32 reference.
    assert jnp.allclose(logit, ref_logit, atol=1e-2, rtol=5e-2), (
        jnp.max(jnp.abs(logit - ref_logit)))
    assert jnp.allclose(sentiment, ref_sent, atol=1e-2, rtol=5e-2), (
        jnp.max(jnp.abs(sentiment - ref_sent)))

    print("KERNEL_OK")
</pallas_src>

<mosaic_0001>
module attributes {stable_mosaic.version = 11 : i64} {
  func.func @bpm_mt_kernel(%arg0: i32, %arg1: memref<2x256xf32, #tpu.memory_space<vmem>>, %arg2: memref<2x8xi32, #tpu.memory_space<vmem>>, %arg3: memref<256x128xbf16, #tpu.memory_space<vmem>>, %arg4: memref<32x768xbf16, #tpu.memory_space<vmem>>, %arg5: memref<128x192xbf16, #tpu.memory_space<vmem>>, %arg6: memref<768x192xbf16, #tpu.memory_space<vmem>>, %arg7: memref<1x192xf32, #tpu.memory_space<vmem>>, %arg8: memref<192x128xbf16, #tpu.memory_space<vmem>>, %arg9: memref<1x128xf32, #tpu.memory_space<vmem>>, %arg10: memref<2x128xbf16, #tpu.memory_space<vmem>>) attributes {dimension_semantics = [#tpu.dimension_semantics<parallel>], iteration_bounds = array<i64: 1>, scalar_prefetch = 0 : i64, scratch_operands = 0 : i64, tpu.core_type = #tpu.core_type<tc>, window_params = [{transform_indices = @transform_0, window_bounds = array<i64: 2, 256>}, {transform_indices = @transform_1, window_bounds = array<i64: 2, 8>}, {pipeline_mode = #tpu.pipeline_mode<synchronous>, transform_indices = @transform_2, window_bounds = array<i64: 256, 128>}, {pipeline_mode = #tpu.pipeline_mode<synchronous>, transform_indices = @transform_3, window_bounds = array<i64: 32, 768>}, {pipeline_mode = #tpu.pipeline_mode<synchronous>, transform_indices = @transform_4, window_bounds = array<i64: 128, 192>}, {pipeline_mode = #tpu.pipeline_mode<synchronous>, transform_indices = @transform_5, window_bounds = array<i64: 768, 192>}, {pipeline_mode = #tpu.pipeline_mode<synchronous>, transform_indices = @transform_6, window_bounds = array<i64: 1, 192>}, {pipeline_mode = #tpu.pipeline_mode<synchronous>, transform_indices = @transform_7, window_bounds = array<i64: 192, 128>}, {pipeline_mode = #tpu.pipeline_mode<synchronous>, transform_indices = @transform_8, window_bounds = array<i64: 1, 128>}, {transform_indices = @transform_9, window_bounds = array<i64: 2, 128>}]} {
    %c0 = arith.constant 0 : index
    %c0_0 = arith.constant 0 : index
    %0 = vector.load %arg1[%c0, %c0_0] : memref<2x256xf32, #tpu.memory_space<vmem>>, vector<2x256xf32>
    %1 = arith.truncf %0 : vector<2x256xf32> to vector<2x256xbf16>
    %c0_1 = arith.constant 0 : index
    %c0_2 = arith.constant 0 : index
    %2 = vector.load %arg3[%c0_1, %c0_2] : memref<256x128xbf16, #tpu.memory_space<vmem>>, vector<256x128xbf16>
    %cst = arith.constant dense<0.000000e+00> : vector<2x128xf32>
    %3 = tpu.matmul %1, %2, %cst {dimension_numbers = #tpu.dot_dimension_numbers<[1], [0], [0], [1], [0, 0, 1, 1], [], []>} : vector<2x256xbf16>, vector<256x128xbf16>, vector<2x128xf32> -> vector<2x128xf32>
    %4 = math.tanh %3 : vector<2x128xf32>
    %c0_3 = arith.constant 0 : index
    %c0_4 = arith.constant 0 : index
    %5 = vector.load %arg2[%c0_3, %c0_4] : memref<2x8xi32, #tpu.memory_space<vmem>>, vector<2x8xi32>
    %6 = tpu.iota {dimensions = array<i32: 1>} : vector<2x32xi32>
    %cst_5 = arith.constant 0.000000e+00 : f32
    %7 = vector.broadcast %cst_5 : f32 to vector<2x32xf32>
    %8 = vector.extract_strided_slice %5 {offsets = [0, 0], sizes = [2, 1], strides = [1, 1]} : vector<2x8xi32> to vector<2x1xi32>
    %9 = vector.broadcast %8 : vector<2x1xi32> to vector<2x32xi32>
    %10 = arith.cmpi eq, %9, %6 : vector<2x32xi32>
    %11 = arith.extui %10 : vector<2x32xi1> to vector<2x32xi32>
    %12 = arith.sitofp %11 : vector<2x32xi32> to vector<2x32xf32>
    %13 = arith.addf %7, %12 : vector<2x32xf32>
    %14 = vector.extract_strided_slice %5 {offsets = [0, 1], sizes = [2, 1], strides = [1, 1]} : vector<2x8xi32> to vector<2x1xi32>
    %15 = vector.broadcast %14 : vector<2x1xi32> to vector<2x32xi32>
    %16 = arith.cmpi eq, %15, %6 : vector<2x32xi32>
    %17 = arith.extui %16 : vector<2x32xi1> to vector<2x32xi32>
    %18 = arith.sitofp %17 : vector<2x32xi32> to vector<2x32xf32>
    %19 = arith.addf %13, %18 : vector<2x32xf32>
    %20 = vector.extract_strided_slice %5 {offsets = [0, 2], sizes = [2, 1], strides = [1, 1]} : vector<2x8xi32> to vector<2x1xi32>
    %21 = vector.broadcast %20 : vector<2x1xi32> to vector<2x32xi32>
    %22 = arith.cmpi eq, %21, %6 : vector<2x32xi32>
    %23 = arith.extui %22 : vector<2x32xi1> to vector<2x32xi32>
    %24 = arith.sitofp %23 : vector<2x32xi32> to vector<2x32xf32>
    %25 = arith.addf %19, %24 : vector<2x32xf32>
    %26 = vector.extract_strided_slice %5 {offsets = [0, 3], sizes = [2, 1], strides = [1, 1]} : vector<2x8xi32> to vector<2x1xi32>
    %27 = vector.broadcast %26 : vector<2x1xi32> to vector<2x32xi32>
    %28 = arith.cmpi eq, %27, %6 : vector<2x32xi32>
    %29 = arith.extui %28 : vector<2x32xi1> to vector<2x32xi32>
    %30 = arith.sitofp %29 : vector<2x32xi32> to vector<2x32xf32>
    %31 = arith.addf %25, %30 : vector<2x32xf32>
    %32 = vector.extract_strided_slice %5 {offsets = [0, 4], sizes = [2, 1], strides = [1, 1]} : vector<2x8xi32> to vector<2x1xi32>
    %33 = vector.broadcast %32 : vector<2x1xi32> to vector<2x32xi32>
    %34 = arith.cmpi eq, %33, %6 : vector<2x32xi32>
    %35 = arith.extui %34 : vector<2x32xi1> to vector<2x32xi32>
    %36 = arith.sitofp %35 : vector<2x32xi32> to vector<2x32xf32>
    %37 = arith.addf %31, %36 : vector<2x32xf32>
    %38 = vector.extract_strided_slice %5 {offsets = [0, 5], sizes = [2, 1], strides = [1, 1]} : vector<2x8xi32> to vector<2x1xi32>
    %39 = vector.broadcast %38 : vector<2x1xi32> to vector<2x32xi32>
    %40 = arith.cmpi eq, %39, %6 : vector<2x32xi32>
    %41 = arith.extui %40 : vector<2x32xi1> to vector<2x32xi32>
    %42 = arith.sitofp %41 : vector<2x32xi32> to vector<2x32xf32>
    %43 = arith.addf %37, %42 : vector<2x32xf32>
    %44 = vector.extract_strided_slice %5 {offsets = [0, 6], sizes = [2, 1], strides = [1, 1]} : vector<2x8xi32> to vector<2x1xi32>
    %45 = vector.broadcast %44 : vector<2x1xi32> to vector<2x32xi32>
    %46 = arith.cmpi eq, %45, %6 : vector<2x32xi32>
    %47 = arith.extui %46 : vector<2x32xi1> to vector<2x32xi32>
    %48 = arith.sitofp %47 : vector<2x32xi32> to vector<2x32xf32>
    %49 = arith.addf %43, %48 : vector<2x32xf32>
    %50 = vector.extract_strided_slice %5 {offsets = [0, 7], sizes = [2, 1], strides = [1, 1]} : vector<2x8xi32> to vector<2x1xi32>
    %51 = vector.broadcast %50 : vector<2x1xi32> to vector<2x32xi32>
    %52 = arith.cmpi eq, %51, %6 : vector<2x32xi32>
    %53 = arith.extui %52 : vector<2x32xi1> to vector<2x32xi32>
    %54 = arith.sitofp %53 : vector<2x32xi32> to vector<2x32xf32>
    %55 = arith.addf %49, %54 : vector<2x32xf32>
    %cst_6 = arith.constant 1.250000e-01 : f32
    %56 = vector.broadcast %cst_6 : f32 to vector<2x32xf32>
    %57 = arith.mulf %55, %56 : vector<2x32xf32>
    %58 = arith.truncf %57 : vector<2x32xf32> to vector<2x32xbf16>
    %c0_7 = arith.constant 0 : index
    %c0_8 = arith.constant 0 : index
    %59 = vector.load %arg4[%c0_7, %c0_8] : memref<32x768xbf16, #tpu.memory_space<vmem>>, vector<32x768xbf16>
    %cst_9 = arith.constant dense<0.000000e+00> : vector<2x768xf32>
    %60 = tpu.matmul %58, %59, %cst_9 {dimension_numbers = #tpu.dot_dimension_numbers<[1], [0], [0], [1], [0, 0, 1, 1], [], []>} : vector<2x32xbf16>, vector<32x768xbf16>, vector<2x768xf32> -> vector<2x768xf32>
    %61 = arith.truncf %4 : vector<2x128xf32> to vector<2x128xbf16>
    %c0_10 = arith.constant 0 : index
    %c0_11 = arith.constant 0 : index
    %62 = vector.load %arg5[%c0_10, %c0_11] : memref<128x192xbf16, #tpu.memory_space<vmem>>, vector<128x192xbf16>
    %cst_12 = arith.constant dense<0.000000e+00> : vector<2x192xf32>
    %63 = tpu.matmul %61, %62, %cst_12 {dimension_numbers = #tpu.dot_dimension_numbers<[1], [0], [0], [1], [0, 0, 1, 1], [], []>} : vector<2x128xbf16>, vector<128x192xbf16>, vector<2x192xf32> -> vector<2x192xf32>
    %64 = arith.truncf %60 : vector<2x768xf32> to vector<2x768xbf16>
    %c0_13 = arith.constant 0 : index
    %c0_14 = arith.constant 0 : index
    %65 = vector.load %arg6[%c0_13, %c0_14] : memref<768x192xbf16, #tpu.memory_space<vmem>>, vector<768x192xbf16>
    %cst_15 = arith.constant dense<0.000000e+00> : vector<2x192xf32>
    %66 = tpu.matmul %64, %65, %cst_15 {dimension_numbers = #tpu.dot_dimension_numbers<[1], [0], [0], [1], [0, 0, 1, 1], [], []>} : vector<2x768xbf16>, vector<768x192xbf16>, vector<2x192xf32> -> vector<2x192xf32>
    %67 = arith.addf %63, %66 : vector<2x192xf32>
    %c0_16 = arith.constant 0 : index
    %c0_17 = arith.constant 0 : index
    %68 = vector.load %arg7[%c0_16, %c0_17] : memref<1x192xf32, #tpu.memory_space<vmem>>, vector<1x192xf32>
    %69 = vector.broadcast %68 : vector<1x192xf32> to vector<2x192xf32>
    %70 = arith.addf %67, %69 : vector<2x192xf32>
    %cst_18 = arith.constant 0.000000e+00 : f32
    %71 = vector.broadcast %cst_18 : f32 to vector<2x192xf32>
    %72 = arith.maximumf %70, %71 : vector<2x192xf32>
    %73 = arith.truncf %72 : vector<2x192xf32> to vector<2x192xbf16>
    %c0_19 = arith.constant 0 : index
    %c0_20 = arith.constant 0 : index
    %74 = vector.load %arg8[%c0_19, %c0_20] : memref<192x128xbf16, #tpu.memory_space<vmem>>, vector<192x128xbf16>
    %cst_21 = arith.constant dense<0.000000e+00> : vector<2x128xf32>
    %75 = tpu.matmul %73, %74, %cst_21 {dimension_numbers = #tpu.dot_dimension_numbers<[1], [0], [0], [1], [0, 0, 1, 1], [], []>} : vector<2x192xbf16>, vector<192x128xbf16>, vector<2x128xf32> -> vector<2x128xf32>
    %c0_22 = arith.constant 0 : index
    %c0_23 = arith.constant 0 : index
    %76 = vector.load %arg9[%c0_22, %c0_23] : memref<1x128xf32, #tpu.memory_space<vmem>>, vector<1x128xf32>
    %77 = vector.broadcast %76 : vector<1x128xf32> to vector<2x128xf32>
    %78 = arith.addf %75, %77 : vector<2x128xf32>
    %79 = arith.truncf %78 : vector<2x128xf32> to vector<2x128xbf16>
    %c0_24 = arith.constant 0 : index
    %c0_25 = arith.constant 0 : index
    %80 = vector.load %arg10[%c0_24, %c0_25] : memref<2x128xbf16, #tpu.memory_space<vmem>>, vector<2x128xbf16>
    tpu.vector_store %arg10[%c0_24, %c0_25], %79 {strides = array<i32>} : memref<2x128xbf16, #tpu.memory_space<vmem>>, vector<2x128xbf16>,
    return
  }
  func.func @transform_0(%arg0: i32) -> (i32, i32) {
    %c0_i32 = arith.constant 0 : i32
    %c0_i32_0 = arith.constant 0 : i32
    return %arg0, %c0_i32 : i32, i32
  }
  func.func @transform_1(%arg0: i32) -> (i32, i32) {
    %c0_i32 = arith.constant 0 : i32
    %c0_i32_0 = arith.constant 0 : i32
    return %arg0, %c0_i32 : i32, i32
  }
  func.func @transform_2(%arg0: i32) -> (i32, i32) {
    %c0_i32 = arith.constant 0 : i32
    %c0_i32_0 = arith.constant 0 : i32
    %c0_i32_1 = arith.constant 0 : i32
    return %c0_i32, %c0_i32_0 : i32, i32
  }
  func.func @transform_3(%arg0: i32) -> (i32, i32) {
    %c0_i32 = arith.constant 0 : i32
    %c0_i32_0 = arith.constant 0 : i32
    %c0_i32_1 = arith.constant 0 : i32
    return %c0_i32, %c0_i32_0 : i32, i32
  }
  func.func @transform_4(%arg0: i32) -> (i32, i32) {
    %c0_i32 = arith.constant 0 : i32
    %c0_i32_0 = arith.constant 0 : i32
    %c0_i32_1 = arith.constant 0 : i32
    return %c0_i32, %c0_i32_0 : i32, i32
  }
  func.func @transform_5(%arg0: i32) -> (i32, i32) {
    %c0_i32 = arith.constant 0 : i32
    %c0_i32_0 = arith.constant 0 : i32
    %c0_i32_1 = arith.constant 0 : i32
    return %c0_i32, %c0_i32_0 : i32, i32
  }
  func.func @transform_6(%arg0: i32) -> (i32, i32) {
    %c0_i32 = arith.constant 0 : i32
    %c0_i32_0 = arith.constant 0 : i32
    %c0_i32_1 = arith.constant 0 : i32
    return %c0_i32, %c0_i32_0 : i32, i32
  }
  func.func @transform_7(%arg0: i32) -> (i32, i32) {
    %c0_i32 = arith.constant 0 : i32
    %c0_i32_0 = arith.constant 0 : i32
    %c0_i32_1 = arith.constant 0 : i32
    return %c0_i32, %c0_i32_0 : i32, i32
  }
  func.func @transform_8(%arg0: i32) -> (i32, i32) {
    %c0_i32 = arith.constant 0 : i32
    %c0_i32_0 = arith.constant 0 : i32
    %c0_i32_1 = arith.constant 0 : i32
    return %c0_i32, %c0_i32_0 : i32, i32
  }
  func.func @transform_9(%arg0: i32) -> (i32, i32) {
    %c0_i32 = arith.constant 0 : i32
    %c0_i32_0 = arith.constant 0 : i32
    return %arg0, %c0_i32 : i32, i32
  }
}

</mosaic_0001>

<bundles_post_ra>
// kernel: tpu_custom_call.1
= control target key start
LH: loop header
LB: loop body
LE: loop exit
PB: predicated region body
PF: predicated region fallthrough
CT: control target
= control target key end

     0   :  { %v2257_v1 = vmov 0   ;;  %v2258_v2 = vmov 2   ;;  %s3204_s0 = inlined_call_operand.vmem [shape: f32[2,256], index: 0, kind: input, shape index: {}]   ;;  %s3205_s1 = inlined_call_operand.vmem [shape: s32[2,8], index: 1, kind: input, shape index: {}]   ;;  %s3206_s2 = inlined_call_operand.vmem [shape: bf16[256,128], index: 2, kind: input, shape index: {}]   ;;  %s3207_s3 = inlined_call_operand.vmem [shape: bf16[32,768], index: 3, kind: input, shape index: {}]   ;;  %s3208_s4 = inlined_call_operand.vmem [shape: bf16[128,192], index: 4, kind: input, shape index: {}]   ;;  %s3209_s5 = inlined_call_operand.vmem [shape: bf16[768,192], index: 5, kind: input, shape index: {}]   ;;  %s3210_s6 = inlined_call_operand.vmem [shape: f32[1,192], index: 6, kind: input, shape index: {}]   ;;  %s3211_s7 = inlined_call_operand.vmem [shape: bf16[192,128], index: 7, kind: input, shape index: {}]   ;;  %s3212_s8 = inlined_call_operand.vmem [shape: f32[1,128], index: 8, kind: input, shape index: {}]   ;;  %s3213_s9 = inlined_call_operand.hbm [shape: bf16[2,128], index: 9, kind: output, shape index: {}]  }
   0x1   :  { %v198_v0 = vld [vmem:[%s3205_s1] sm:$0x3]  ;;  %2219 = vset.pattern.permute.xlu0 %v2257_v1  ;;  %2221 = vset.pattern.permute.xlu1 %v2258_v2 }
   0x2   :  { %202 = vperm.xlu0 %2219, %v198_v0   ;;  %216 = vperm.xlu1 %2221, %v198_v0  }
   0x3   :  { %14 = vsyncpa [#allocation3], 0  ;;  %v2259_v3 = vmov 4   ;;  %v2260_v4 = vmov 1   ;;  %v2261_v5 = vmov 3   ;;  %v2262_v6 = vmov 5  }
   0x4   :  { %2223 = vset.pattern.permute.xlu2 %v2259_v3  ;;  %v2263_v7 = vmov 6   ;;  %v2264_v8 = vmov 7   ;;  %v1532_v9 = vld [vmem:[%s3207_s3 + $0x30] sm:$0xf]  ;;  %v2082_v10 = vld [vmem:[%s3207_s3 + $0x44] sm:$0xf0]  ;;  %v199_v28 = vlaneseq }
   0x5   :  { %230 = vperm.xlu2 %2223, %v198_v0   ;;  %v2079_v11 = vld [vmem:[%s3207_s3 + $0x34] sm:$0xf]  ;;  %v1533_v12 = vor.u32 %v2082_v10, %v1532_v9  ;;  %v1534_v13 = vld [vmem:[%s3207_s3 + $0x48] sm:$0xf0]  ;;  %v1508_v15 = vld [vmem:[%s3207_s3] sm:$0xf] }
   0x6   :  { %v1537_v14 = vor.u32 %v2079_v11, %v1534_v13  ;;  %v2076_v16 = vld [vmem:[%s3207_s3 + $0x14] sm:$0xf0]  ;;  %v2073_v17 = vld [vmem:[%s3207_s3 + $0x4] sm:$0xf]  ;;  %v1510_v19 = vld [vmem:[%s3207_s3 + $0x18] sm:$0xf0] }
   0x7   :  { %341 = vmatpush.bf16.msra.mxu2 %v1533_v12  ;;  %v1509_v18 = vor.u32 %v2076_v16, %v1508_v15  ;;  %v1513_v20 = vor.u32 %v2073_v17, %v1510_v19  ;;  %v1540_v22 = vld [vmem:[%s3207_s3 + $0x38] sm:$0xf]  ;;  %v2083_v23 = vld [vmem:[%s3207_s3 + $0x4c] sm:$0xf0]  ;;  %v2080_v25 = vld [vmem:[%s3207_s3 + $0x3c] sm:$0xf] }
   0x8   :  { %354 = vmatpush.bf16.msra.mxu3 %v1537_v14  ;;  %v1541_v24 = vor.u32 %v2083_v23, %v1540_v22  ;;  %v1542_v26 = vld [vmem:[%s3207_s3 + $0x50] sm:$0xf0]  ;;  %v1516_v27 = vld [vmem:[%s3207_s3 + $0x8] sm:$0xf]  ;;  %v2077_v32 = vld [vmem:[%s3207_s3 + $0x1c] sm:$0xf0] }
   0x9   :  { %v1545_v31 = vor.u32 %v2080_v25, %v1542_v26  ;;  %v2074_v33 = vld [vmem:[%s3207_s3 + $0xc] sm:$0xf]  ;;  %v1518_v34 = vld [vmem:[%s3207_s3 + $0x20] sm:$0xf0]  ;;  %v1517_v35 = vor.u32 %v2077_v32, %v1516_v27  ;;  %v200_v37 = vand.u32 127, %v199_v28  ;;  %v2265_v41 = vmov 0.0  }
   0xa   :  { %2220 = vset.pattern.permute.xlu0 %v2260_v4  ;;  %2222 = vset.pattern.permute.xlu1 %v2261_v5  ;;  %v1521_v36 = vor.u32 %v2074_v33, %v1518_v34  ;;  %v2064_v49 = vld [vmem:[%s3206_s2 + $0x38] sm:$0xff]  ;;  %v2063_v53 = vld [vmem:[%s3206_s2 + $0x30] sm:$0xff]  ;;  %v2062_v61 = vld [vmem:[%s3206_s2 + $0x28] sm:$0xff]  ;;  %vm331_vm8 = vcmask 261120   ;;  %vm1386_vm9 = vcmask 523264   ;;  %s1425_s23 = sshll.u32 %s3213_s9, 4  ;;  %s1426_s23 = int_to_ptr.hbm [resolvable:$true] %s1425_s23 }
   0xb   :  { %209 = vperm.xlu0 %2220, %v198_v0   ;;  %223 = vperm.xlu1 %2222, %v198_v0   ;;  %v2072_v50 = vld [vmem:[%s3206_s2 + $0x78] sm:$0xff]  ;;  %v2071_v54 = vld [vmem:[%s3206_s2 + $0x70] sm:$0xff]  ;;  %v2070_v62 = vld [vmem:[%s3206_s2 + $0x68] sm:$0xff] }
   0xc   :  { %342 = vmatpush.bf16.msra.mxu2 %v1509_v18  ;;  %355 = vmatpush.bf16.msra.mxu3 %v1513_v20  ;;  %v2084_v2 = vld [vmem:[%s3207_s3 + $0x54] sm:$0xf0]  ;;  %v2081_v3 = vld [vmem:[%s3207_s3 + $0x44] sm:$0xf]  ;;  %v1550_v4 = vld [vmem:[%s3207_s3 + $0x58] sm:$0xf0] }
   0xd   :  { %2224 = vset.pattern.permute.xlu2 %v2262_v6  ;;  %171 = vmatpush.bf16.msra.mxu0 %v2064_v49  ;;  %v2078_v10 = vld [vmem:[%s3207_s3 + $0x24] sm:$0xf0]  ;;  %v2075_v11 = vld [vmem:[%s3207_s3 + $0x14] sm:$0xf]  ;;  %v1526_v12 = vld [vmem:[%s3207_s3 + $0x28] sm:$0xf0] }
   0xe   :  { %237 = vperm.xlu2 %2224, %v198_v0   ;;  %184 = vmatpush.bf16.msra.mxu1 %v2072_v50  ;;  %v2061_v13 = vld [vmem:[%s3206_s2 + $0x20] sm:$0xff]  ;;  %v1529_v16 = vor.u32 %v2075_v11, %v1526_v12  ;;  %v2060_v17 = vld [vmem:[%s3206_s2 + $0x18] sm:$0xff]  ;;  %v2059_v20 = vld [vmem:[%s3206_s2 + $0x10] sm:$0xff] }
   0xf   :  { %v2069_v14 = vld [vmem:[%s3206_s2 + $0x60] sm:$0xff]  ;;  %v2068_v18 = vld [vmem:[%s3206_s2 + $0x58] sm:$0xff]  ;;  %v2058_v22 = vld [vmem:[%s3206_s2 + $0x8] sm:$0xff] }
  0x10   :  { %367 = vmatpush.bf16.msrb.mxu2 %v1541_v24  ;;  %380 = vmatpush.bf16.msrb.mxu3 %v1545_v31  ;;  %v34_v19 = vld [vmem:[%s3204_s0] sm:$0xf]  ;;  %v2066_v23 = vld [vmem:[%s3206_s2 + $0x48] sm:$0xff]  ;;  %v1746_v24 = vld [vmem:[%s3209_s5 + $0x170] sm:$0xf]  ;;  %s2266_s0 = smov [#allocation2]  }
  0x11   :  { %172 = vmatpush.bf16.msra.mxu0 %v2063_v53  ;;  %36 = vst [vmem:[#allocation1] ss:$4 sm:$0xff] %v34_v19  ;;  %v2148_v25 = vld [vmem:[%s3209_s5 + $0x174] sm:$0xf0]  ;;  %v1810_v26 = vld [vmem:[%s3209_s5 + $0x1f0] sm:$0xf] }
  0x12   :  { %185 = vmatpush.bf16.msra.mxu1 %v2071_v54  ;;  %v2164_v27 = vld [vmem:[%s3209_s5 + $0x1f4] sm:$0xf0]  ;;  %v1618_v28 = vld [vmem:[%s3209_s5 + $0x70] sm:$0xf]  ;;  %v2057_v32 = vld [vmem:[%s3206_s2] sm:$0xff]  ;;  %v1747_v34 = vor.u32 %v2148_v25, %v1746_v24  ;;  %s1423_s21 = sshll.u32 %s2266_s0, 4  ;;  %s1424_s21 = int_to_ptr.vmem [resolvable:$true] %s1423_s21 }
  0x13   :  { %2225 = vset.pattern.permute.xlu1 %v2263_v7  ;;  %2227 = vset.pattern.permute.xlu0 %v2264_v8  ;;  %v1553_v7 = vor.u32 %v2081_v3, %v1550_v4  ;;  %v2132_v31 = vld [vmem:[%s3209_s5 + $0xf4] sm:$0xf0]  ;;  %v1602_v50 = vld [vmem:[%s3209_s5 + $0x50] sm:$0xf]  ;;  %v2142_v4 = vld [vmem:[%s3209_s5 + $0x144] sm:$0xf0] }
  0x14   :  { %244 = vperm.xlu1 %2225, %v198_v0   ;;  %368 = vmatpush.bf16.msrb.mxu2 %v1517_v35  ;;  %v1811_v35 = vor.u32 %v2164_v27, %v1810_v26  ;;  %v1730_v53 = vld [vmem:[%s3209_s5 + $0x150] sm:$0xf]  ;;  %v2156_v19 = vld [vmem:[%s3209_s5 + $0x1b4] sm:$0xf0]  ;;  %v1706_v26 = vld [vmem:[%s3209_s5 + $0x120] sm:$0xf] }
  0x15   :  { %381 = vmatpush.bf16.msrb.mxu3 %v1521_v36  ;;  %173 = vmatpush.bf16.msra.mxu0 %v2062_v61  ;;  %v2065_v36 = vld [vmem:[%s3206_s2 + $0x40] sm:$0xff]  ;;  %v2128_v61 = vld [vmem:[%s3209_s5 + $0xd4] sm:$0xf0]  ;;  %v1586_v11 = vld [vmem:[%s3209_s5 + $0x30] sm:$0xf] }
  0x16   :  { %2226 = vset.pattern.permute.xlu2 %v2264_v8  ;;  %186 = vmatpush.bf16.msra.mxu1 %v2070_v62  ;;  %v1524_v8 = vld [vmem:[%s3207_s3 + $0x10] sm:$0xf]  ;;  %v1594_v62 = vld [vmem:[%s3209_s5 + $0x40] sm:$0xf] }
  0x17   :  { %251 = vperm.xlu2 %2226, %v198_v0   ;;  %v1548_v0 = vld [vmem:[%s3207_s3 + $0x40] sm:$0xf]  ;;  %v1525_v15 = vor.u32 %v2078_v10, %v1524_v8  ;;  %v2126_v10 = vld [vmem:[%s3209_s5 + $0xc4] sm:$0xf0] }
  0x18   :  { %v1549_v6 = vor.u32 %v2084_v2, %v1548_v0  ;;  %v37_v33 = vld.sshfl [vmem:[#allocation1] sm:$0xff pattern:$0x73625140] }
  0x19   :  { %174 = vmatpush.bf16.msra.mxu0 %v2061_v13  ;;  %v1658_v8 = vld [vmem:[%s3209_s5 + $0xc0] sm:$0xf] }
  0x1a   :  { %187 = vmatpush.bf16.msra.mxu1 %v2069_v14  ;;  %v1714_v14 = vld [vmem:[%s3209_s5 + $0x130] sm:$0xf] }
  0x1d   :  { %175 = vmatpush.bf16.msra.mxu0 %v2060_v17  ;;  %v2140_v17 = vld [vmem:[%s3209_s5 + $0x134] sm:$0xf0] }
  0x1e   :  { %188 = vmatpush.bf16.msra.mxu1 %v2068_v18  ;;  %v1778_v18 = vld [vmem:[%s3209_s5 + $0x1b0] sm:$0xf]  ;;  %v1715_v24 = vor.u32 %v2140_v17, %v1714_v14  ;;  %v2129_v17 = vld [vmem:[%s3209_s5 + $0xe4] sm:$0xf] }
  0x1f   :  { %v1779_v25 = vor.u32 %v2156_v19, %v1778_v18  ;;  %v1676_v18 = vld [vmem:[%s3209_s5 + $0xe8] sm:$0xf0] }
  0x21   :  { %176 = vmatpush.bf16.msra.mxu0 %v2059_v20  ;;  %v2108_v20 = vld [vmem:[%s3209_s5 + $0x34] sm:$0xf0] }
  0x22   :  { %v1587_v27 = vor.u32 %v2108_v20, %v1586_v11  ;;  %v1930_v11 = vld [vmem:[%s3209_s5 + $0x2e0] sm:$0xf] }
  0x25   :  { %177 = vmatpush.bf16.msra.mxu0 %v2058_v22  ;;  %v2124_v22 = vld [vmem:[%s3209_s5 + $0xb4] sm:$0xf0] }
  0x29   :  { %178 = vmatpush.bf16.msra.mxu0 %v2057_v32  ;;  %v2106_v32 = vld [vmem:[%s3209_s5 + $0x24] sm:$0xf0] }
  0x5f   :  { %v231_v21 = vpop.permute.xlu2 %230 }
  0x60   :  { %vm232_vm4 = vcmp.eq.s32.totalorder %v231_v21, %v200_v37  ;;  %v2067_v21 = vld [vmem:[%s3206_s2 + $0x50] sm:$0xff] }
  0x61   :  { %v1502_v52 = vsel %vm232_vm4, 1.0, %v2265_v41  ;;  %189 = vmatpush.bf16.msra.mxu1 %v2067_v21  ;;  %v1650_v21 = vld [vmem:[%s3209_s5 + $0xb0] sm:$0xf] }
  0x65   :  { %190 = vmatpush.bf16.msra.mxu1 %v2066_v23  ;;  %v1578_v23 = vld [vmem:[%s3209_s5 + $0x20] sm:$0xf] }
  0x68   :  { %v238_v38 = vpop.permute.xlu2 %237 }
  0x69   :  { %vm239_vm5 = vcmp.eq.s32.totalorder %v238_v38, %v200_v37  ;;  %v1610_v38 = vld [vmem:[%s3209_s5 + $0x60] sm:$0xf]  ;;  %191 = vmatpush.bf16.msra.mxu1 %v2065_v36 }
  0x6a   :  { %v1503_v57 = vsel %vm239_vm5, 1.0, %v2265_v41 }
  0x71   :  { %v252_v48 = vpop.permute.xlu2 %251 }
  0x72   :  { %vm253_vm6 = vcmp.eq.s32.totalorder %v252_v48, %v200_v37  ;;  %v41_v48 = vpack.c.bf16 %v37_v33, %v37_v33  ;;  %v1642_v33 = vld [vmem:[%s3209_s5 + $0xa0] sm:$0xf] }
  0x73   :  { %v1505_v60 = vsel %vm253_vm6, 1.0, %v2265_v41 }
  0x74   :  { %v203_v29 = vpop.permute.xlu0 %202  ;;  %v217_v30 = vpop.permute.xlu1 %216  ;;  %179 = vmatmul.bf16.vlgmr.msra.gmra.mxu0 %v41_v48  ;;  %v1626_v48 = vld [vmem:[%s3209_s5 + $0x80] sm:$0xf] }
  0x75   :  { %vm204_vm0 = vcmp.eq.s32.totalorder %v203_v29, %v200_v37  ;;  %vm218_vm1 = vcmp.eq.s32.totalorder %v217_v30, %v200_v37  ;;  %v2116_v29 = vld [vmem:[%s3209_s5 + $0x74] sm:$0xf0]  ;;  %v1682_v30 = vld [vmem:[%s3209_s5 + $0xf0] sm:$0xf] }
  0x76   :  { %v1498_v42 = vsel %vm204_vm0, 1.0, %v2265_v41  ;;  %v1500_v45 = vsel %vm218_vm1, 1.0, %v2265_v41 }
  0x7d   :  { %v210_v39 = vpop.permute.xlu0 %209  ;;  %v224_v40 = vpop.permute.xlu1 %223 }
  0x7e   :  { %vm211_vm2 = vcmp.eq.s32.totalorder %v210_v39, %v200_v37  ;;  %vm225_vm3 = vcmp.eq.s32.totalorder %v224_v40, %v200_v37  ;;  %v1738_v39 = vld [vmem:[%s3209_s5 + $0x160] sm:$0xf]  ;;  %v1619_v40 = vor.u32 %v2116_v29, %v1618_v28  ;;  %v1651_v28 = vor.u32 %v2124_v22, %v1650_v21  ;;  %v2138_v29 = vld [vmem:[%s3209_s5 + $0x124] sm:$0xf0]  ;;  %v1858_v21 = vld [vmem:[%s3209_s5 + $0x250] sm:$0xf] }
  0x7f   :  { %v1499_v43 = vsel %vm211_vm2, 1.0, %v2265_v41  ;;  %v1501_v47 = vsel %vm225_vm3, 1.0, %v2265_v41  ;;  %v1707_v36 = vor.u32 %v2138_v29, %v1706_v26  ;;  %v2176_v22 = vld [vmem:[%s3209_s5 + $0x254] sm:$0xf0]  ;;  %v1679_v26 = vor.u32 %v2129_v17, %v1676_v18  ;;  %v2127_v29 = vld [vmem:[%s3209_s5 + $0xd4] sm:$0xf] }
  0x80   :  { %v214_v44 = vadd.f32 %v1499_v43, %v1498_v42  ;;  %v2146_v42 = vld [vmem:[%s3209_s5 + $0x164] sm:$0xf0]  ;;  %v1802_v43 = vld [vmem:[%s3209_s5 + $0x1e0] sm:$0xf]  ;;  %1012 = vmatpush.bf16.msrb.mxu0 %v1619_v40  ;;  %v2136_v40 = vld [vmem:[%s3209_s5 + $0x114] sm:$0xf0] }
  0x81   :  { %v1644_v17 = vld [vmem:[%s3209_s5 + $0xa8] sm:$0xf0] }
  0x82   :  { %v221_v46 = vadd.f32 %v1500_v45, %v214_v44  ;;  %v2162_v44 = vld [vmem:[%s3209_s5 + $0x1e4] sm:$0xf0] }
  0x83   :  { %v2114_v45 = vld [vmem:[%s3209_s5 + $0x64] sm:$0xf0] }
  0x84   :  { %v228_v51 = vadd.f32 %v1501_v47, %v221_v46  ;;  %v1674_v46 = vld [vmem:[%s3209_s5 + $0xe0] sm:$0xf]  ;;  %v2130_v47 = vld [vmem:[%s3209_s5 + $0xe4] sm:$0xf0]  ;;  %v1611_v54 = vor.u32 %v2114_v45, %v1610_v38  ;;  %v1579_v38 = vor.u32 %v2106_v32, %v1578_v23  ;;  %v2120_v45 = vld [vmem:[%s3209_s5 + $0x94] sm:$0xf0] }
  0x85   :  { %v1922_v23 = vld [vmem:[%s3209_s5 + $0x2d0] sm:$0xf] }
  0x86   :  { %v235_v55 = vadd.f32 %v1502_v52, %v228_v51  ;;  %v245_v56 = vpop.permute.xlu1 %244  ;;  %v1739_v51 = vor.u32 %v2146_v42, %v1738_v39  ;;  %v1803_v52 = vor.u32 %v2162_v44, %v1802_v43  ;;  %1013 = vmatpush.bf16.msrb.mxu0 %v1611_v54  ;;  %v2152_v42 = vld [vmem:[%s3209_s5 + $0x194] sm:$0xf0]  ;;  %v1634_v44 = vld [vmem:[%s3209_s5 + $0x90] sm:$0xf]  ;;  %v2134_v54 = vld [vmem:[%s3209_s5 + $0x104] sm:$0xf0] }
  0x87   :  { %vm246_vm7 = vcmp.eq.s32.totalorder %v245_v56, %v200_v37  ;;  %v38_v37 = vld.sshfl [vmem:[#allocation1 + $0x8] sm:$0xff pattern:$0x73625140]  ;;  %v2144_v56 = vld [vmem:[%s3209_s5 + $0x154] sm:$0xf0] }
  0x88   :  { %v242_v58 = vadd.f32 %v1503_v57, %v235_v55  ;;  %v1504_v59 = vsel %vm246_vm7, 1.0, %v2265_v41  ;;  %v1683_v41 = vor.u32 %v2132_v31, %v1682_v30  ;;  %v42_v49 = vpack.c.bf16 %v38_v37, %v38_v37  ;;  %v1794_v57 = vld [vmem:[%s3209_s5 + $0x1d0] sm:$0xf]  ;;  %v1770_v30 = vld [vmem:[%s3209_s5 + $0x1a0] sm:$0xf] }
  0x89   :  { %v1675_v55 = vor.u32 %v2130_v47, %v1674_v46  ;;  %v2154_v31 = vld [vmem:[%s3209_s5 + $0x1a4] sm:$0xf0]  ;;  %v1698_v37 = vld [vmem:[%s3209_s5 + $0x110] sm:$0xf]  ;;  %v2104_v43 = vld [vmem:[%s3209_s5 + $0x14] sm:$0xf0] }
  0x8a   :  { %v249_v63 = vadd.f32 %v1504_v59, %v242_v58  ;;  %1025 = vmatpush.bf16.msrb.mxu1 %v1683_v41  ;;  %v2160_v58 = vld [vmem:[%s3209_s5 + $0x1d4] sm:$0xf0]  ;;  %v1762_v41 = vld [vmem:[%s3209_s5 + $0x190] sm:$0xf]  ;;  %v1562_v46 = vld [vmem:[%s3209_s5] sm:$0xf] }
  0x8b   :  { %v2112_v59 = vld [vmem:[%s3209_s5 + $0x54] sm:$0xf0]  ;;  %192 = vmatmul.bf16.vlgmr.msra.gmra.mxu1 %v42_v49  ;;  %v1795_v0 = vor.u32 %v2160_v58, %v1794_v57  ;;  %v2102_v47 = vld [vmem:[%s3209_s5 + $0x4] sm:$0xf0]  ;;  %v1699_v49 = vor.u32 %v2136_v40, %v1698_v37  ;;  %v1874_v58 = vld [vmem:[%s3209_s5 + $0x270] sm:$0xf] }
  0x8c   :  { %v256_v1 = vadd.f32 %v1505_v60, %v249_v63  ;;  %v1666_v60 = vld [vmem:[%s3209_s5 + $0xd0] sm:$0xf]  ;;  %v1731_v63 = vor.u32 %v2144_v56, %v1730_v53  ;;  %v1603_v2 = vor.u32 %v2112_v59, %v1602_v50  ;;  %v1763_v50 = vor.u32 %v2152_v42, %v1762_v41  ;;  %v2150_v56 = vld [vmem:[%s3209_s5 + $0x184] sm:$0xf0]  ;;  %v2180_v59 = vld [vmem:[%s3209_s5 + $0x274] sm:$0xf0] }
  0x8d   :  { %v1667_v3 = vor.u32 %v2128_v61, %v1666_v60  ;;  %v1635_v53 = vor.u32 %v2120_v45, %v1634_v44  ;;  %v2118_v57 = vld [vmem:[%s3209_s5 + $0x84] sm:$0xf0]  ;;  %v1938_v60 = vld [vmem:[%s3209_s5 + $0x2f0] sm:$0xf]  ;;  %v2196_v61 = vld [vmem:[%s3209_s5 + $0x2f4] sm:$0xf0] }
  0x8e   :  { %v257_v5 = vmul.f32 0.125, %v256_v1  ;;  %v1722_v1 = vld [vmem:[%s3209_s5 + $0x140] sm:$0xf]  ;;  %1026 = vmatpush.bf16.msrb.mxu1 %v1675_v55  ;;  %1014 = vmatpush.bf16.msrb.mxu0 %v1603_v2  ;;  %v2131_v2 = vld [vmem:[%s3209_s5 + $0xf4] sm:$0xf] }
  0x8f   :  { %v1723_v12 = vor.u32 %v2142_v4, %v1722_v1  ;;  %v1754_v55 = vld [vmem:[%s3209_s5 + $0x180] sm:$0xf]  ;;  %v1620_v1 = vld [vmem:[%s3209_s5 + $0x78] sm:$0xf0]  ;;  %v1563_v4 = vor.u32 %v2102_v47, %v1562_v46  ;;  %v1842_v40 = vld [vmem:[%s3209_s5 + $0x230] sm:$0xf] }
  0x90   :  { %v2401_v9 = vpack.c.bf16 %v257_v5, %v257_v5  ;;  %v1786_v5 = vld [vmem:[%s3209_s5 + $0x1c0] sm:$0xf]  ;;  %v2172_v41 = vld [vmem:[%s3209_s5 + $0x234] sm:$0xf0]  ;;  %v1906_v42 = vld [vmem:[%s3209_s5 + $0x2b0] sm:$0xf] }
  0x91   :  { %v1843_v44 = vor.u32 %v2172_v41, %v1842_v40  ;;  %v1834_v46 = vld [vmem:[%s3209_s5 + $0x220] sm:$0xf]  ;;  %v2170_v47 = vld [vmem:[%s3209_s5 + $0x224] sm:$0xf0]  ;;  %v1740_v41 = vld [vmem:[%s3209_s5 + $0x168] sm:$0xf0] }
  0x92   :  { %1554 = vmatmul.msk.bf16.vlgmr.msra.gmra.mxu2 %vm331_vm8, %v2401_v9  ;;  %1555 = vmatmul.msk.bf16.vlgmr.msra.gmra.mxu3 %vm331_vm8, %v2401_v9 }
  0x93   :  { %393 = vmatpush.bf16.msra.mxu2 %v1549_v6  ;;  %406 = vmatpush.bf16.msra.mxu3 %v1553_v7  ;;  %v2158_v6 = vld [vmem:[%s3209_s5 + $0x1c4] sm:$0xf0] }
  0x94   :  { %v2110_v7 = vld [vmem:[%s3209_s5 + $0x44] sm:$0xf0]  ;;  %v1787_v13 = vor.u32 %v2158_v6, %v1786_v5  ;;  %1027 = vmatpush.bf16.msrb.mxu1 %v1667_v3  ;;  %v1684_v3 = vld [vmem:[%s3209_s5 + $0xf8] sm:$0xf0]  ;;  %v1627_v5 = vor.u32 %v2118_v57, %v1626_v48  ;;  %v1875_v6 = vor.u32 %v2180_v59, %v1874_v58  ;;  %v1898_v48 = vld [vmem:[%s3209_s5 + $0x2a0] sm:$0xf] }
  0x95   :  { %v1687_v14 = vor.u32 %v2131_v2, %v1684_v3  ;;  %v2109_v57 = vld [vmem:[%s3209_s5 + $0x44] sm:$0xf]  ;;  %v1596_v58 = vld [vmem:[%s3209_s5 + $0x48] sm:$0xf0]  ;;  %v1882_v2 = vld [vmem:[%s3209_s5 + $0x280] sm:$0xf] }
  0x97   :  { %394 = vmatpush.bf16.msra.mxu2 %v1525_v15  ;;  %407 = vmatpush.bf16.msra.mxu3 %v1529_v16  ;;  %v1595_v15 = vor.u32 %v2110_v7, %v1594_v62  ;;  %v1659_v16 = vor.u32 %v2126_v10, %v1658_v8  ;;  %v2115_v62 = vld [vmem:[%s3209_s5 + $0x74] sm:$0xf]  ;;  %v1939_v7 = vor.u32 %v2196_v61, %v1938_v60  ;;  %v1866_v8 = vld [vmem:[%s3209_s5 + $0x260] sm:$0xf]  ;;  %v2178_v10 = vld [vmem:[%s3209_s5 + $0x264] sm:$0xf0] }
  0x98   :  { %v1867_v19 = vor.u32 %v2178_v10, %v1866_v8  ;;  %v1599_v60 = vor.u32 %v2109_v57, %v1596_v58  ;;  %v2125_v61 = vld [vmem:[%s3209_s5 + $0xc4] sm:$0xf]  ;;  %v2123_v10 = vld [vmem:[%s3209_s5 + $0xb4] sm:$0xf]  ;;  %v1788_v57 = vld [vmem:[%s3209_s5 + $0x1c8] sm:$0xf0] }
  0x99   :  { %1015 = vmatpush.bf16.msrb.mxu0 %v1595_v15  ;;  %1028 = vmatpush.bf16.msrb.mxu1 %v1659_v16  ;;  %v2113_v15 = vld [vmem:[%s3209_s5 + $0x64] sm:$0xf]  ;;  %v1612_v16 = vld [vmem:[%s3209_s5 + $0x68] sm:$0xf0] }
  0x9d   :  { %1016 = vmatpush.bf16.msrb.mxu0 %v1587_v27  ;;  %1029 = vmatpush.bf16.msrb.mxu1 %v1651_v28  ;;  %v2111_v27 = vld [vmem:[%s3209_s5 + $0x54] sm:$0xf]  ;;  %v1604_v28 = vld [vmem:[%s3209_s5 + $0x58] sm:$0xf0] }
  0xa1   :  { %1017 = vmatpush.bf16.msrb.mxu0 %v1579_v38 }
  0xa2   :  { %1556 = vmatmul.msk.bf16.vlgmr.msrb.gmra.mxu2 %vm331_vm8, %v2401_v9  ;;  %1557 = vmatmul.msk.bf16.vlgmr.msrb.gmra.mxu3 %vm331_vm8, %v2401_v9 }
  0xa3   :  { %1038 = vmatpush.bf16.msrb.mxu2 %v1747_v34  ;;  %1051 = vmatpush.bf16.msrb.mxu3 %v1811_v35  ;;  %v2122_v34 = vld [vmem:[%s3209_s5 + $0xa4] sm:$0xf0]  ;;  %v1570_v35 = vld [vmem:[%s3209_s5 + $0x10] sm:$0xf] }
  0xa4   :  { %v1643_v39 = vor.u32 %v2122_v34, %v1642_v33  ;;  %v1850_v33 = vld [vmem:[%s3209_s5 + $0x240] sm:$0xf]  ;;  %v2174_v34 = vld [vmem:[%s3209_s5 + $0x244] sm:$0xf0] }
  0xa5   :  { %v1851_v38 = vor.u32 %v2174_v34, %v1850_v33  ;;  %v2163_v33 = vld [vmem:[%s3209_s5 + $0x1f4] sm:$0xf]  ;;  %v1812_v34 = vld [vmem:[%s3209_s5 + $0x1f8] sm:$0xf0] }
  0xa6   :  { %1030 = vmatpush.bf16.msrb.mxu1 %v1643_v39 }
  0xa7   :  { %1039 = vmatpush.bf16.msrb.mxu2 %v1739_v51  ;;  %1052 = vmatpush.bf16.msrb.mxu3 %v1803_v52  ;;  %v1690_v51 = vld [vmem:[%s3209_s5 + $0x100] sm:$0xf]  ;;  %v1571_v52 = vor.u32 %v2104_v43, %v1570_v35  ;;  %v2188_v43 = vld [vmem:[%s3209_s5 + $0x2b4] sm:$0xf0] }
  0xa8   :  { %v1914_v35 = vld [vmem:[%s3209_s5 + $0x2c0] sm:$0xf]  ;;  %v1907_v45 = vor.u32 %v2188_v43, %v1906_v42  ;;  %v2161_v42 = vld [vmem:[%s3209_s5 + $0x1e4] sm:$0xf]  ;;  %v1804_v43 = vld [vmem:[%s3209_s5 + $0x1e8] sm:$0xf0] }
  0xa9   :  { %1018 = vmatpush.bf16.msrb.mxu0 %v1571_v52  ;;  %v1826_v52 = vld [vmem:[%s3209_s5 + $0x210] sm:$0xf] }
  0xaa   :  { %1031 = vmatpush.bf16.msrb.mxu1 %v1635_v53  ;;  %v2168_v53 = vld [vmem:[%s3209_s5 + $0x214] sm:$0xf0] }
  0xab   :  { %1040 = vmatpush.bf16.msrb.mxu2 %v1731_v63  ;;  %1053 = vmatpush.bf16.msrb.mxu3 %v1795_v0  ;;  %v1691_v63 = vor.u32 %v2134_v54, %v1690_v51  ;;  %v1755_v0 = vor.u32 %v2150_v56, %v1754_v55  ;;  %v1890_v54 = vld [vmem:[%s3209_s5 + $0x290] sm:$0xf]  ;;  %v1827_v55 = vor.u32 %v2168_v53, %v1826_v52  ;;  %v2184_v56 = vld [vmem:[%s3209_s5 + $0x294] sm:$0xf0] }
  0xac   :  { %v1891_v59 = vor.u32 %v2184_v56, %v1890_v54  ;;  %v2141_v54 = vld [vmem:[%s3209_s5 + $0x144] sm:$0xf] }
  0xad   :  { %1019 = vmatpush.bf16.msrb.mxu0 %v1563_v4  ;;  %v2182_v4 = vld [vmem:[%s3209_s5 + $0x284] sm:$0xf0]  ;;  %v2157_v56 = vld [vmem:[%s3209_s5 + $0x1c4] sm:$0xf] }
  0xae   :  { %1032 = vmatpush.bf16.msrb.mxu1 %v1627_v5  ;;  %v2107_v5 = vld [vmem:[%s3209_s5 + $0x34] sm:$0xf] }
  0xaf   :  { %1041 = vmatpush.bf16.msrb.mxu2 %v1723_v12  ;;  %1054 = vmatpush.bf16.msrb.mxu3 %v1787_v13  ;;  %v2194_v12 = vld [vmem:[%s3209_s5 + $0x2e4] sm:$0xf0]  ;;  %v1623_v13 = vor.u32 %v2115_v62, %v1620_v1  ;;  %v1660_v62 = vld [vmem:[%s3209_s5 + $0xc8] sm:$0xf0] }
  0xb0   :  { %v1931_v20 = vor.u32 %v2194_v12, %v1930_v11  ;;  %v2166_v1 = vld [vmem:[%s3209_s5 + $0x204] sm:$0xf0]  ;;  %v1652_v11 = vld [vmem:[%s3209_s5 + $0xb8] sm:$0xf0] }
  0xb1   :  { %1064 = vmatpush.bf16.msra.mxu0 %v1875_v6  ;;  %v1588_v6 = vld [vmem:[%s3209_s5 + $0x38] sm:$0xf0]  ;;  %v1655_v12 = vor.u32 %v2123_v10, %v1652_v11  ;;  %v2177_v11 = vld [vmem:[%s3209_s5 + $0x264] sm:$0xf] }
  0xb2   :  { %1558 = vmatmul.msk.bf16.vlgmr.msra.gmra.mxu2 %vm331_vm8, %v2401_v9  ;;  %1559 = vmatmul.msk.bf16.vlgmr.msra.gmra.mxu3 %vm331_vm8, %v2401_v9  ;;  %v1771_v9 = vor.u32 %v2154_v31, %v1770_v30  ;;  %v1668_v30 = vld [vmem:[%s3209_s5 + $0xd8] sm:$0xf0]  ;;  %v1859_v31 = vor.u32 %v2176_v22, %v1858_v21  ;;  %v1591_v8 = vor.u32 %v2107_v5, %v1588_v6  ;;  %v2119_v21 = vld [vmem:[%s3209_s5 + $0x94] sm:$0xf] }
  0xb3   :  { %1042 = vmatpush.bf16.msrb.mxu2 %v1715_v24  ;;  %1055 = vmatpush.bf16.msrb.mxu3 %v1779_v25  ;;  %v2192_v24 = vld [vmem:[%s3209_s5 + $0x2d4] sm:$0xf0]  ;;  %v1615_v25 = vor.u32 %v2113_v15, %v1612_v16  ;;  %v1671_v37 = vor.u32 %v2127_v29, %v1668_v30  ;;  %v2121_v15 = vld [vmem:[%s3209_s5 + $0xa4] sm:$0xf]  ;;  %v1636_v22 = vld [vmem:[%s3209_s5 + $0x98] sm:$0xf0] }
  0xb4   :  { %1077 = vmatpush.bf16.msra.mxu1 %v1939_v7  ;;  %v1923_v32 = vor.u32 %v2192_v24, %v1922_v23  ;;  %v1883_v7 = vor.u32 %v2182_v4, %v1882_v2  ;;  %v1647_v18 = vor.u32 %v2121_v15, %v1644_v17  ;;  %v1639_v24 = vor.u32 %v2119_v21, %v1636_v22  ;;  %v1628_v29 = vld [vmem:[%s3209_s5 + $0x88] sm:$0xf0]  ;;  %v2155_v2 = vld [vmem:[%s3209_s5 + $0x1b4] sm:$0xf]  ;;  %v2193_v17 = vld [vmem:[%s3209_s5 + $0x2e4] sm:$0xf] }
  0xb5   :  { %1065 = vmatpush.bf16.msra.mxu0 %v1867_v19  ;;  %v2103_v19 = vld [vmem:[%s3209_s5 + $0x14] sm:$0xf]  ;;  %v2153_v21 = vld [vmem:[%s3209_s5 + $0x1a4] sm:$0xf]  ;;  %v1772_v22 = vld [vmem:[%s3209_s5 + $0x1a8] sm:$0xf0] }
  0xb7   :  { %1043 = vmatpush.bf16.msrb.mxu2 %v1707_v36  ;;  %1056 = vmatpush.bf16.msrb.mxu3 %v1771_v9  ;;  %v2190_v36 = vld [vmem:[%s3209_s5 + $0x2c4] sm:$0xf0]  ;;  %v1607_v9 = vor.u32 %v2111_v27, %v1604_v28  ;;  %v2117_v27 = vld [vmem:[%s3209_s5 + $0x84] sm:$0xf] }
  0xb8   :  { %1078 = vmatpush.bf16.msra.mxu1 %v1931_v20  ;;  %v1915_v39 = vor.u32 %v2190_v36, %v1914_v35  ;;  %v1572_v20 = vld [vmem:[%s3209_s5 + $0x18] sm:$0xf0]  ;;  %v1631_v30 = vor.u32 %v2117_v27, %v1628_v29  ;;  %v2191_v29 = vld [vmem:[%s3209_s5 + $0x2d4] sm:$0xf] }
  0xb9   :  { %1066 = vmatpush.bf16.msra.mxu0 %v1859_v31  ;;  %v1575_v23 = vor.u32 %v2103_v19, %v1572_v20  ;;  %v2147_v31 = vld [vmem:[%s3209_s5 + $0x174] sm:$0xf]  ;;  %v2137_v19 = vld [vmem:[%s3209_s5 + $0x124] sm:$0xf]  ;;  %v1708_v20 = vld [vmem:[%s3209_s5 + $0x128] sm:$0xf0] }
  0xba   :  { %v1711_v27 = vor.u32 %v2137_v19, %v1708_v20  ;;  %v2097_v19 = vld [vmem:[%s3208_s4 + $0x64] sm:$0xf]  ;;  %v1996_v20 = vld [vmem:[%s3208_s4 + $0x68] sm:$0xf0] }
  0xbb   :  { %1044 = vmatpush.bf16.msrb.mxu2 %v1699_v49  ;;  %1057 = vmatpush.bf16.msrb.mxu3 %v1763_v50  ;;  %v2186_v49 = vld [vmem:[%s3209_s5 + $0x2a4] sm:$0xf0]  ;;  %v1835_v50 = vor.u32 %v2170_v47, %v1834_v46  ;;  %v2143_v46 = vld [vmem:[%s3209_s5 + $0x154] sm:$0xf]  ;;  %v1732_v47 = vld [vmem:[%s3209_s5 + $0x158] sm:$0xf0] }
  0xbc   :  { %1079 = vmatpush.bf16.msra.mxu1 %v1923_v32  ;;  %v1899_v51 = vor.u32 %v2186_v49, %v1898_v48  ;;  %v1748_v32 = vld [vmem:[%s3209_s5 + $0x178] sm:$0xf0]  ;;  %v2159_v48 = vld [vmem:[%s3209_s5 + $0x1d4] sm:$0xf]  ;;  %v1735_v52 = vor.u32 %v2143_v46, %v1732_v47  ;;  %v2189_v46 = vld [vmem:[%s3209_s5 + $0x2c4] sm:$0xf] }
  0xbd   :  { %1067 = vmatpush.bf16.msra.mxu0 %v1851_v38  ;;  %v2145_v38 = vld [vmem:[%s3209_s5 + $0x164] sm:$0xf]  ;;  %v1796_v49 = vld [vmem:[%s3209_s5 + $0x1d8] sm:$0xf0]  ;;  %v1916_v47 = vld [vmem:[%s3209_s5 + $0x2c8] sm:$0xf0] }
  0xbe   :  { %v1799_v53 = vor.u32 %v2159_v48, %v1796_v49  ;;  %v2133_v48 = vld [vmem:[%s3209_s5 + $0x104] sm:$0xf]  ;;  %v1692_v49 = vld [vmem:[%s3209_s5 + $0x108] sm:$0xf0] }
  0xbf   :  { %1045 = vmatpush.bf16.msrb.mxu2 %v1691_v63  ;;  %1058 = vmatpush.bf16.msrb.mxu3 %v1755_v0  ;;  %v1663_v63 = vor.u32 %v2125_v61, %v1660_v62  ;;  %v1818_v0 = vld [vmem:[%s3209_s5 + $0x200] sm:$0xf]  ;;  %v1876_v61 = vld [vmem:[%s3209_s5 + $0x278] sm:$0xf0]  ;;  %v2195_v62 = vld [vmem:[%s3209_s5 + $0x2f4] sm:$0xf] }
  0xc0   :  { %1080 = vmatpush.bf16.msra.mxu1 %v1915_v39  ;;  %v1819_v3 = vor.u32 %v2166_v1, %v1818_v0  ;;  %v2139_v0 = vld [vmem:[%s3209_s5 + $0x134] sm:$0xf]  ;;  %v1716_v1 = vld [vmem:[%s3209_s5 + $0x138] sm:$0xf0] }
  0xc1   :  { %1068 = vmatpush.bf16.msra.mxu0 %v1843_v44  ;;  %v1743_v44 = vor.u32 %v2145_v38, %v1740_v41  ;;  %v1719_v15 = vor.u32 %v2139_v0, %v1716_v1 }
  0xc3   :  { %1090 = vmatpush.bf16.msra.mxu2 %v1623_v13  ;;  %1103 = vmatpush.bf16.msra.mxu3 %v1687_v14  ;;  %v2105_v13 = vld [vmem:[%s3209_s5 + $0x24] sm:$0xf]  ;;  %v1580_v14 = vld [vmem:[%s3209_s5 + $0x28] sm:$0xf0] }
  0xc4   :  { %1081 = vmatpush.bf16.msra.mxu1 %v1907_v45  ;;  %v1583_v16 = vor.u32 %v2105_v13, %v1580_v14  ;;  %v1807_v45 = vor.u32 %v2161_v42, %v1804_v43  ;;  %v2173_v42 = vld [vmem:[%s3209_s5 + $0x244] sm:$0xf]  ;;  %v1852_v43 = vld [vmem:[%s3209_s5 + $0x248] sm:$0xf0] }
  0xc5   :  { %1069 = vmatpush.bf16.msra.mxu0 %v1835_v50 }
  0xc7   :  { %1091 = vmatpush.bf16.msra.mxu2 %v1615_v25  ;;  %1104 = vmatpush.bf16.msra.mxu3 %v1679_v26  ;;  %v2101_v25 = vld [vmem:[%s3209_s5 + $0x4] sm:$0xf]  ;;  %v1564_v26 = vld [vmem:[%s3209_s5 + $0x8] sm:$0xf0] }
  0xc8   :  { %1082 = vmatpush.bf16.msra.mxu1 %v1899_v51  ;;  %v1567_v28 = vor.u32 %v2101_v25, %v1564_v26  ;;  %v2175_v25 = vld [vmem:[%s3209_s5 + $0x254] sm:$0xf]  ;;  %v1860_v26 = vld [vmem:[%s3209_s5 + $0x258] sm:$0xf0] }
  0xc9   :  { %1070 = vmatpush.bf16.msra.mxu0 %v1827_v55  ;;  %v1724_v55 = vld [vmem:[%s3209_s5 + $0x148] sm:$0xf0]  ;;  %v1863_v38 = vor.u32 %v2175_v25, %v1860_v26  ;;  %v1999_v26 = vor.u32 %v2097_v19, %v1996_v20  ;;  %v2203_v19 = vld [vmem:[%s3211_s7 + $0x30] sm:$0xff] }
  0xca   :  { %v1727_v58 = vor.u32 %v2141_v54, %v1724_v55  ;;  %v1695_v54 = vor.u32 %v2133_v48, %v1692_v49  ;;  %v2202_v20 = vld [vmem:[%s3211_s7 + $0x28] sm:$0xff] }
  0xcb   :  { %1092 = vmatpush.bf16.msra.mxu2 %v1607_v9  ;;  %1105 = vmatpush.bf16.msra.mxu3 %v1671_v37  ;;  %v1751_v9 = vor.u32 %v2147_v31, %v1748_v32  ;;  %v1815_v37 = vor.u32 %v2163_v33, %v1812_v34  ;;  %v2135_v31 = vld [vmem:[%s3209_s5 + $0x114] sm:$0xf]  ;;  %v1700_v32 = vld [vmem:[%s3209_s5 + $0x118] sm:$0xf0] }
  0xcc   :  { %1083 = vmatpush.bf16.msra.mxu1 %v1891_v59  ;;  %v1791_v59 = vor.u32 %v2157_v56, %v1788_v57  ;;  %v2151_v33 = vld [vmem:[%s3209_s5 + $0x194] sm:$0xf]  ;;  %v1764_v34 = vld [vmem:[%s3209_s5 + $0x198] sm:$0xf0] }
  0xcd   :  { %1071 = vmatpush.bf16.msra.mxu0 %v1819_v3  ;;  %v1780_v3 = vld [vmem:[%s3209_s5 + $0x1b8] sm:$0xf0]  ;;  %v2171_v56 = vld [vmem:[%s3209_s5 + $0x234] sm:$0xf] }
  0xce   :  { %v1844_v57 = vld [vmem:[%s3209_s5 + $0x238] sm:$0xf0] }
  0xcf   :  { %1093 = vmatpush.bf16.msra.mxu2 %v1599_v60  ;;  %1106 = vmatpush.bf16.msra.mxu3 %v1663_v63  ;;  %v2179_v60 = vld [vmem:[%s3209_s5 + $0x274] sm:$0xf]  ;;  %v1940_v63 = vld [vmem:[%s3209_s5 + $0x2f8] sm:$0xf0] }
  0xd0   :  { %1084 = vmatpush.bf16.msra.mxu1 %v1883_v7  ;;  %v1943_v10 = vor.u32 %v2195_v62, %v1940_v63  ;;  %v2099_v62 = vld [vmem:[%s3208_s4 + $0x74] sm:$0xf]  ;;  %v2004_v63 = vld [vmem:[%s3208_s4 + $0x78] sm:$0xf0] }
  0xd3   :  { %1094 = vmatpush.bf16.msra.mxu2 %v1591_v8  ;;  %1107 = vmatpush.bf16.msra.mxu3 %v1655_v12  ;;  %v1879_v8 = vor.u32 %v2179_v60, %v1876_v61  ;;  %v1868_v12 = vld [vmem:[%s3209_s5 + $0x268] sm:$0xf0]  ;;  %v2002_v60 = vld [vmem:[%s3208_s4 + $0x70] sm:$0xf]  ;;  %v2100_v61 = vld [vmem:[%s3208_s4 + $0x74] sm:$0xf0] }
  0xd7   :  { %1095 = vmatpush.bf16.msra.mxu2 %v1583_v16  ;;  %1108 = vmatpush.bf16.msra.mxu3 %v1647_v18  ;;  %v1783_v16 = vor.u32 %v2155_v2, %v1780_v3  ;;  %v1932_v18 = vld [vmem:[%s3209_s5 + $0x2e8] sm:$0xf0]  ;;  %v1847_v2 = vor.u32 %v2171_v56, %v1844_v57  ;;  %v1962_v56 = vld [vmem:[%s3208_s4 + $0x20] sm:$0xf]  ;;  %v2090_v57 = vld [vmem:[%s3208_s4 + $0x24] sm:$0xf0] }
  0xdb   :  { %1096 = vmatpush.bf16.msra.mxu2 %v1575_v23  ;;  %1109 = vmatpush.bf16.msra.mxu3 %v1639_v24  ;;  %v1871_v23 = vor.u32 %v2177_v11, %v1868_v12  ;;  %v1935_v24 = vor.u32 %v2193_v17, %v1932_v18  ;;  %v2003_v11 = vor.u32 %v2100_v61, %v2002_v60  ;;  %v1994_v17 = vld [vmem:[%s3208_s4 + $0x60] sm:$0xf]  ;;  %v2098_v18 = vld [vmem:[%s3208_s4 + $0x64] sm:$0xf0]  ;;  %v1954_v61 = vld [vmem:[%s3208_s4 + $0x10] sm:$0xf] }
  0xdc   :  { %v2007_v12 = vor.u32 %v2099_v62, %v2004_v63  ;;  %v1995_v25 = vor.u32 %v2098_v18, %v1994_v17  ;;  %v2088_v62 = vld [vmem:[%s3208_s4 + $0x14] sm:$0xf0] }
  0xdd   :  { %v1955_v63 = vor.u32 %v2088_v62, %v1954_v61  ;;  %v2204_v18 = vld [vmem:[%s3211_s7 + $0x38] sm:$0xff] }
  0xdf   :  { %1097 = vmatpush.bf16.msra.mxu2 %v1567_v28  ;;  %1110 = vmatpush.bf16.msra.mxu3 %v1631_v30  ;;  %v1775_v28 = vor.u32 %v2153_v21, %v1772_v22  ;;  %v1924_v30 = vld [vmem:[%s3209_s5 + $0x2d8] sm:$0xf0] }
  0xe0   :  { %v1927_v41 = vor.u32 %v2191_v29, %v1924_v30  ;;  %v2095_v29 = vld [vmem:[%s3208_s4 + $0x54] sm:$0xf]  ;;  %v1988_v30 = vld [vmem:[%s3208_s4 + $0x58] sm:$0xf0] }
  0xf1   :  { %v2919_v4 = vpop.f32.mrf.mxu0 }
 0x108   :  { %v2921_v5 = vpop.f32.mrf.mxu1 }
 0x109   :  { %v194_v60 = vadd.f32 %v2921_v5, %v2919_v4  ;;  %v2087_v4 = vld [vmem:[%s3208_s4 + $0x14] sm:$0xf]  ;;  %v1956_v5 = vld [vmem:[%s3208_s4 + $0x18] sm:$0xf0] }
 0x10b   :  { %2229 = vtanh.f32 %v194_v60 }
 0x115   :  { %v344_v35 = vpop.f32.mrf.mxu2  ;;  %v357_v36 = vpop.f32.mrf.mxu3 }
 0x116   :  { %v2856_v39 = vpack.c.bf16 %v344_v35, %v344_v35  ;;  %v2858_v40 = vpack.c.bf16 %v357_v36, %v357_v36  ;;  %v182_v35 = vpop.f32.mrf.mxu0  ;;  %v195_v36 = vpop.f32.mrf.mxu1 }
 0x117   :  { %v2165_v35 = vld [vmem:[%s3209_s5 + $0x204] sm:$0xf]  ;;  %v1820_v36 = vld [vmem:[%s3209_s5 + $0x208] sm:$0xf0] }
 0x118   :  { %1020 = vmatmul.bf16.vlgmr.msrb.gmra.mxu0 %v2856_v39  ;;  %1033 = vmatmul.bf16.vlgmr.msrb.gmra.mxu1 %v2858_v40 }
 0x119   :  { %1116 = vmatpush.bf16.msrb.mxu0 %v1751_v9  ;;  %1129 = vmatpush.bf16.msrb.mxu1 %v1815_v37 }
 0x11d   :  { %v346_v50 = vpop.f32.mrf.mxu2  ;;  %v359_v51 = vpop.f32.mrf.mxu3  ;;  %1117 = vmatpush.bf16.msrb.mxu0 %v1743_v44  ;;  %1130 = vmatpush.bf16.msrb.mxu1 %v1807_v45  ;;  %v1703_v44 = vor.u32 %v2135_v31, %v1700_v32  ;;  %v1767_v45 = vor.u32 %v2151_v33, %v1764_v34 }
 0x11e   :  { %v2149_v50 = vld [vmem:[%s3209_s5 + $0x184] sm:$0xf]  ;;  %v1756_v51 = vld [vmem:[%s3209_s5 + $0x188] sm:$0xf0] }
 0x11f   :  { %v1759_v55 = vor.u32 %v2149_v50, %v1756_v51  ;;  %v1970_v50 = vld [vmem:[%s3208_s4 + $0x30] sm:$0xf]  ;;  %v2092_v51 = vld [vmem:[%s3208_s4 + $0x34] sm:$0xf0] }
 0x121   :  { %1118 = vmatpush.bf16.msrb.mxu0 %v1735_v52  ;;  %1131 = vmatpush.bf16.msrb.mxu1 %v1799_v53  ;;  %v1855_v52 = vor.u32 %v2173_v42, %v1852_v43  ;;  %v1919_v53 = vor.u32 %v2189_v46, %v1916_v47  ;;  %v1978_v42 = vld [vmem:[%s3208_s4 + $0x40] sm:$0xf]  ;;  %v2094_v43 = vld [vmem:[%s3208_s4 + $0x44] sm:$0xf0]  ;;  %v1823_v46 = vor.u32 %v2165_v35, %v1820_v36 }
 0x122   :  { %v1979_v48 = vor.u32 %v2094_v43, %v1978_v42 }
 0x125   :  { %v370_v6 = vpop.f32.mrf.mxu2  ;;  %v383_v7 = vpop.f32.mrf.mxu3  ;;  %1119 = vmatpush.bf16.msrb.mxu0 %v1727_v58  ;;  %1132 = vmatpush.bf16.msrb.mxu1 %v1791_v59  ;;  %v2187_v58 = vld [vmem:[%s3209_s5 + $0x2b4] sm:$0xf]  ;;  %v1908_v59 = vld [vmem:[%s3209_s5 + $0x2b8] sm:$0xf0] }
 0x126   :  { %v2929_v13 = vpack.c.bf16 %v370_v6, %v370_v6  ;;  %v2931_v14 = vpack.c.bf16 %v383_v7, %v383_v7  ;;  %v1911_v7 = vor.u32 %v2187_v58, %v1908_v59  ;;  %v2089_v58 = vld [vmem:[%s3208_s4 + $0x24] sm:$0xf]  ;;  %v1964_v59 = vld [vmem:[%s3208_s4 + $0x28] sm:$0xf0] }
 0x128   :  { %1046 = vmatmul.bf16.vlgmr.msrb.gmra.mxu2 %v2929_v13  ;;  %1059 = vmatmul.bf16.vlgmr.msrb.gmra.mxu3 %v2931_v14 }
 0x129   :  { %1142 = vmatpush.bf16.msrb.mxu2 %v1879_v8  ;;  %1155 = vmatpush.bf16.msrb.mxu3 %v1943_v10  ;;  %v2169_v8 = vld [vmem:[%s3209_s5 + $0x224] sm:$0xf]  ;;  %v1836_v10 = vld [vmem:[%s3209_s5 + $0x228] sm:$0xf0] }
 0x12a   :  { %1120 = vmatpush.bf16.msrb.mxu0 %v1719_v15  ;;  %1133 = vmatpush.bf16.msrb.mxu1 %v1783_v16  ;;  %v2185_v15 = vld [vmem:[%s3209_s5 + $0x2a4] sm:$0xf]  ;;  %v1900_v16 = vld [vmem:[%s3209_s5 + $0x2a8] sm:$0xf0]  ;;  %v1839_v21 = vor.u32 %v2169_v8, %v1836_v10 }
 0x12b   :  { %v1903_v22 = vor.u32 %v2185_v15, %v1900_v16 }
 0x12d   :  { %v372_v9 = vpop.f32.mrf.mxu2  ;;  %v385_v37 = vpop.f32.mrf.mxu3  ;;  %1143 = vmatpush.bf16.msrb.mxu2 %v1871_v23  ;;  %1156 = vmatpush.bf16.msrb.mxu3 %v1935_v24  ;;  %v2167_v23 = vld [vmem:[%s3209_s5 + $0x214] sm:$0xf]  ;;  %v1828_v24 = vld [vmem:[%s3209_s5 + $0x218] sm:$0xf0] }
 0x12e   :  { %1121 = vmatpush.bf16.msrb.mxu0 %v1711_v27  ;;  %1134 = vmatpush.bf16.msrb.mxu1 %v1775_v28  ;;  %v1986_v27 = vld [vmem:[%s3208_s4 + $0x50] sm:$0xf]  ;;  %v2096_v28 = vld [vmem:[%s3208_s4 + $0x54] sm:$0xf0]  ;;  %v1831_v33 = vor.u32 %v2167_v23, %v1828_v24  ;;  %v1991_v37 = vor.u32 %v2095_v29, %v1988_v30  ;;  %v2201_v23 = vld [vmem:[%s3211_s7 + $0x20] sm:$0xff] }
 0x12f   :  { %v1987_v9 = vor.u32 %v2096_v28, %v1986_v27  ;;  %v2208_v24 = vld [vmem:[%s3211_s7 + $0x58] sm:$0xff]  ;;  %v2199_v27 = vld [vmem:[%s3211_s7 + $0x10] sm:$0xff]  ;;  %v2206_v30 = vld [vmem:[%s3211_s7 + $0x48] sm:$0xff] }
 0x131   :  { %1144 = vmatpush.bf16.msrb.mxu2 %v1863_v38  ;;  %1157 = vmatpush.bf16.msrb.mxu3 %v1927_v41  ;;  %v2181_v38 = vld [vmem:[%s3209_s5 + $0x284] sm:$0xf]  ;;  %v1884_v41 = vld [vmem:[%s3209_s5 + $0x288] sm:$0xf0] }
 0x132   :  { %1122 = vmatpush.bf16.msrb.mxu0 %v1703_v44  ;;  %1135 = vmatpush.bf16.msrb.mxu1 %v1767_v45  ;;  %v2093_v44 = vld [vmem:[%s3208_s4 + $0x44] sm:$0xf]  ;;  %v1980_v45 = vld [vmem:[%s3208_s4 + $0x48] sm:$0xf0]  ;;  %v1887_v47 = vor.u32 %v2181_v38, %v1884_v41 }
 0x133   :  { %v1983_v49 = vor.u32 %v2093_v44, %v1980_v45 }
 0x135   :  { %v396_v0 = vpop.f32.mrf.mxu2  ;;  %v409_v1 = vpop.f32.mrf.mxu3  ;;  %1145 = vmatpush.bf16.msrb.mxu2 %v1855_v52  ;;  %1158 = vmatpush.bf16.msrb.mxu3 %v1919_v53  ;;  %v2091_v52 = vld [vmem:[%s3208_s4 + $0x34] sm:$0xf]  ;;  %v1972_v53 = vld [vmem:[%s3208_s4 + $0x38] sm:$0xf0] }
 0x136   :  { %v3025_v3 = vpack.c.bf16 %v396_v0, %v396_v0  ;;  %v3027_v6 = vpack.c.bf16 %v409_v1, %v409_v1  ;;  %1123 = vmatpush.bf16.msrb.mxu0 %v1695_v54  ;;  %1136 = vmatpush.bf16.msrb.mxu1 %v1759_v55  ;;  %v1971_v54 = vor.u32 %v2092_v51, %v1970_v50  ;;  %v1946_v1 = vld [vmem:[%s3208_s4] sm:$0xf] }
 0x137   :  { %v1975_v55 = vor.u32 %v2091_v52, %v1972_v53  ;;  %v1959_v0 = vor.u32 %v2087_v4, %v1956_v5 }
 0x138   :  { %1072 = vmatmul.bf16.vlgmr.msra.gmra.mxu0 %v3025_v3  ;;  %1085 = vmatmul.bf16.vlgmr.msra.gmra.mxu1 %v3027_v6 }
 0x139   :  { %1098 = vmatmul.bf16.vlgmr.msra.gmra.mxu2 %v2856_v39  ;;  %1111 = vmatmul.bf16.vlgmr.msra.gmra.mxu3 %v2858_v40  ;;  %v2183_v39 = vld [vmem:[%s3209_s5 + $0x294] sm:$0xf]  ;;  %v1892_v40 = vld [vmem:[%s3209_s5 + $0x298] sm:$0xf0] }
 0x13a   :  { %1146 = vmatpush.bf16.msrb.mxu2 %v1847_v2  ;;  %1159 = vmatpush.bf16.msrb.mxu3 %v1911_v7  ;;  %v1895_v34 = vor.u32 %v2183_v39, %v1892_v40  ;;  %v2086_v2 = vld [vmem:[%s3208_s4 + $0x4] sm:$0xf0]  ;;  %v2230_v7 = vpop.eup %2229 }
 0x13b   :  { %1248 = vmatpush.bf16.msra.mxu0 %v2003_v11  ;;  %1261 = vmatpush.bf16.msra.mxu1 %v2007_v12  ;;  %v1947_v8 = vor.u32 %v2086_v2, %v1946_v1  ;;  %v413_v11 = vpack.c.bf16 %v2230_v7, %v2230_v7 }
 0x13d   :  { %v398_v31 = vpop.f32.mrf.mxu2  ;;  %v411_v32 = vpop.f32.mrf.mxu3 }
 0x13e   :  { %1147 = vmatpush.bf16.msrb.mxu2 %v1839_v21  ;;  %1160 = vmatpush.bf16.msrb.mxu3 %v1903_v22  ;;  %v2198_v31 = vld [vmem:[%s3211_s7 + $0x8] sm:$0xff]  ;;  %v2205_v32 = vld [vmem:[%s3211_s7 + $0x40] sm:$0xff] }
 0x13f   :  { %1249 = vmatpush.bf16.msra.mxu0 %v1995_v25  ;;  %1262 = vmatpush.bf16.msra.mxu1 %v1999_v26  ;;  %v2200_v25 = vld [vmem:[%s3211_s7 + $0x18] sm:$0xff]  ;;  %v2207_v26 = vld [vmem:[%s3211_s7 + $0x50] sm:$0xff] }
 0x142   :  { %1148 = vmatpush.bf16.msrb.mxu2 %v1831_v33  ;;  %1161 = vmatpush.bf16.msrb.mxu3 %v1895_v34  ;;  %v2197_v33 = vld [vmem:[%s3211_s7] sm:$0xff] }
 0x143   :  { %1250 = vmatpush.bf16.msra.mxu0 %v1987_v9  ;;  %1263 = vmatpush.bf16.msra.mxu1 %v1991_v37 }
 0x146   :  { %1149 = vmatpush.bf16.msrb.mxu2 %v1823_v46  ;;  %1162 = vmatpush.bf16.msrb.mxu3 %v1887_v47 }
 0x147   :  { %1251 = vmatpush.bf16.msra.mxu0 %v1979_v48  ;;  %1264 = vmatpush.bf16.msra.mxu1 %v1983_v49 }
 0x148   :  { %1124 = vmatmul.bf16.vlgmr.msrb.gmra.mxu0 %v2929_v13  ;;  %1137 = vmatmul.bf16.vlgmr.msrb.gmra.mxu1 %v2931_v14  ;;  %v1963_v13 = vor.u32 %v2090_v57, %v1962_v56  ;;  %v1967_v14 = vor.u32 %v2089_v58, %v1964_v59 }
 0x149   :  { %1150 = vmatmul.bf16.vlgmr.msrb.gmra.mxu2 %v3025_v3  ;;  %1163 = vmatmul.bf16.vlgmr.msrb.gmra.mxu3 %v3027_v6  ;;  %v2085_v3 = vld [vmem:[%s3208_s4 + $0x4] sm:$0xf]  ;;  %v1948_v6 = vld [vmem:[%s3208_s4 + $0x8] sm:$0xf0] }
 0x14a   :  { %v1951_v10 = vor.u32 %v2085_v3, %v1948_v6  ;;  %1390 = vmatpush.bf16.msra.mxu2 %v2204_v18  ;;  %1407 = vmatpush.bf16.msra.mxu3 %v2208_v24 }
 0x14b   :  { %1252 = vmatpush.bf16.msra.mxu0 %v1971_v54  ;;  %1265 = vmatpush.bf16.msra.mxu1 %v1975_v55  ;;  %v1274_v55 = vld [vmem:[%s3210_s6] sm:$0x3] }
 0x14c   :  { %v1276_v60 = vperm.slane %v1274_v55, 0 }
 0x14e   :  { %1391 = vmatpush.bf16.msra.mxu2 %v2203_v19  ;;  %1408 = vmatpush.bf16.msra.mxu3 %v2207_v26 }
 0x14f   :  { %1253 = vmatpush.bf16.msra.mxu0 %v1963_v13  ;;  %1266 = vmatpush.bf16.msra.mxu1 %v1967_v14  ;;  %v1277_v13 = vperm.slane %v1274_v55, 1 }
 0x152   :  { %1392 = vmatpush.bf16.msra.mxu2 %v2202_v20  ;;  %1409 = vmatpush.bf16.msra.mxu3 %v2206_v30 }
 0x153   :  { %1254 = vmatpush.bf16.msra.mxu0 %v1955_v63  ;;  %1267 = vmatpush.bf16.msra.mxu1 %v1959_v0 }
 0x156   :  { %1393 = vmatpush.bf16.msra.mxu2 %v2201_v23  ;;  %1410 = vmatpush.bf16.msra.mxu3 %v2205_v32 }
 0x157   :  { %1255 = vmatpush.bf16.msra.mxu0 %v1947_v8  ;;  %1268 = vmatpush.bf16.msra.mxu1 %v1951_v10  ;;  %v2228_v8 = vld [vmem:[%s3212_s8] ss:$0 sm:$0xff] }
 0x15a   :  { %1256 = vmatmul.bf16.vlgmr.msra.gmra.mxu0 %v413_v11  ;;  %1269 = vmatmul.bf16.vlgmr.msra.gmra.mxu1 %v413_v11 }
 0x15b   :  { %1394 = vmatpush.bf16.msra.mxu2 %v2200_v25 }
 0x15f   :  { %1395 = vmatpush.bf16.msra.mxu2 %v2199_v27 }
 0x163   :  { %1396 = vmatpush.bf16.msra.mxu2 %v2198_v31 }
 0x167   :  { %1397 = vmatpush.bf16.msra.mxu2 %v2197_v33 }
 0x195   :  { %v1021_v12 = vpop.f32.mrf.mxu0  ;;  %v1034_v15 = vpop.f32.mrf.mxu1 }
 0x196   :  { %v1035_v43 = vadd.f32 %v1034_v15, %v1021_v12 }
 0x19d   :  { %v1023_v16 = vpop.f32.mrf.mxu0  ;;  %v1036_v17 = vpop.f32.mrf.mxu1 }
 0x1ab   :  { %v1047_v21 = vpop.f32.mrf.mxu2  ;;  %v1060_v22 = vpop.f32.mrf.mxu3 }
 0x1ac   :  { %v1048_v45 = vadd.f32 %v1047_v21, %v1035_v43 }
 0x1ae   :  { %v1061_v51 = vadd.f32 %v1060_v22, %v1048_v45 }
 0x1b3   :  { %v1049_v39 = vpop.f32.mrf.mxu2  ;;  %v1062_v40 = vpop.f32.mrf.mxu3 }
 0x1b5   :  { %v1073_v28 = vpop.f32.mrf.mxu0  ;;  %v1086_v29 = vpop.f32.mrf.mxu1 }
 0x1b6   :  { %v1074_v53 = vadd.f32 %v1073_v28, %v1061_v51 }
 0x1b8   :  { %v1087_v58 = vadd.f32 %v1086_v29, %v1074_v53 }
 0x1bc   :  { %v1099_v34 = vpop.f32.mrf.mxu2  ;;  %v1112_v35 = vpop.f32.mrf.mxu3 }
 0x1bd   :  { %v1075_v36 = vpop.f32.mrf.mxu0  ;;  %v1088_v9 = vpop.f32.mrf.mxu1  ;;  %v1113_v44 = vadd.f32 %v1112_v35, %v1099_v34 }
 0x1c4   :  { %v1101_v37 = vpop.f32.mrf.mxu2  ;;  %v1114_v38 = vpop.f32.mrf.mxu3 }
 0x1c5   :  { %v1125_v41 = vpop.f32.mrf.mxu0  ;;  %v1138_v42 = vpop.f32.mrf.mxu1 }
 0x1c6   :  { %v1126_v46 = vadd.f32 %v1125_v41, %v1113_v44 }
 0x1c8   :  { %v1139_v52 = vadd.f32 %v1138_v42, %v1126_v46 }
 0x1cc   :  { %v1151_v47 = vpop.f32.mrf.mxu2  ;;  %v1164_v48 = vpop.f32.mrf.mxu3 }
 0x1cd   :  { %v1127_v49 = vpop.f32.mrf.mxu0  ;;  %v1140_v50 = vpop.f32.mrf.mxu1  ;;  %v1152_v54 = vadd.f32 %v1151_v47, %v1139_v52 }
 0x1cf   :  { %v1165_v59 = vadd.f32 %v1164_v48, %v1152_v54 }
 0x1d4   :  { %v1153_v56 = vpop.f32.mrf.mxu2  ;;  %v1166_v57 = vpop.f32.mrf.mxu3 }
 0x1d7   :  { %v1257_v14 = vpop.f32.mrf.mxu0  ;;  %v1270_v61 = vpop.f32.mrf.mxu1 }
 0x1d8   :  { %v1258_v62 = vadd.f32 %v1257_v14, %v1087_v58  ;;  %v1271_v4 = vadd.f32 %v1270_v61, %v1165_v59 }
 0x1da   :  { %v1280_v5 = vadd.f32 %v1276_v60, %v1258_v62  ;;  %v1281_v63 = vadd.f32 %v1277_v13, %v1271_v4 }
 0x1dc   :  { %v1282_v0 = vmax.f32 %v1280_v5, 0.0  ;;  %v1283_v1 = vmax.f32 %v1281_v63, 0.0 }
 0x1de   :  { %v1284_v2 = vpack.c.bf16 %v1282_v0, %v1282_v0  ;;  %v1285_v3 = vpack.c.bf16 %v1283_v1, %v1283_v1 }
 0x1df   :  { %v1259_v6 = vpop.f32.mrf.mxu0  ;;  %v1272_v7 = vpop.f32.mrf.mxu1 }
 0x1e0   :  { %1398 = vmatmul.bf16.vlgmr.msra.gmra.mxu2 %v1284_v2  ;;  %2056 = vmatmul.msk.bf16.vlgmr.msra.gmra.mxu3 %vm1386_vm9, %v1285_v3 }
 0x263   :  { %v1399_v10 = vpop.f32.mrf.mxu2  ;;  %v1412_v11 = vpop.f32.mrf.mxu3 }
 0x264   :  { %v1400_v12 = vadd.f32 %v2228_v8, %v1399_v10 }
 0x266   :  { %v1413_v15 = vadd.f32 %v1412_v11, %v1400_v12 }
 0x268   :  { %v1416_v16 = vpack.c.bf16 %v1413_v15, %v1413_v15 }
 0x26a   :  { %1417 = vst [vmem:[#allocation2] sm:$0x1] %v1416_v16 }
 0x26b   :  { %v1401_v17 = vpop.f32.mrf.mxu2  ;;  %v1414_v18 = vpop.f32.mrf.mxu3  ;;  %1428 = dma.vmem_to_hbm [thread:$0]  %s1424_s21, 16, %s1426_s23, [#allocation3]  }
 0x26c   :  { %2255 = dma.done.wait [#allocation3], 16  }
 0x26d   :  { %2256 = vsyncadd [#allocation3], 4294967280 }
 0x26e   :  { %1433 = vsyncpa [#allocation3], 1 }

</bundles_post_ra>
